<compile_context>
chip_gen: v6e
topology: v6e:2x2x1
jax: 0.10.0
libtpu: 0.0.40
codegen_flags: <defaults>
</compile_context>

<pallas_src>
import functools

import jax
import jax.numpy as jnp
from jax.experimental import pallas as pl
from jax.experimental.pallas import tpu as pltpu


def _dequant_kernel(scale_ref, w_ref, o_ref, *, bm, bn, rows_per_step, ms, ns):
    """One grid step dequantizes a (1, rows_per_step*bm, N) row slab.

    scale_ref: flat [E*Ms*Ns] f32 in SMEM (scalar prefetch).
    w_ref:     (1, rows_per_step*bm, N) fp8 slab in VMEM.
    o_ref:     (1, rows_per_step*bm, N) bf16 slab in VMEM.
    """
    e = pl.program_id(0)
    i = pl.program_id(1)
    base = e * (ms * ns) + i * (rows_per_step * ns)
    # Static, 128-aligned block loop (unrolled): each iteration scales one full
    # vreg-aligned (bm, bn) tile by one scalar read from SMEM.
    for r in range(rows_per_step):
        for c in range(ns):
            s = scale_ref[base + r * ns + c]                       # f32 scalar
            blk = w_ref[0, pl.ds(r * bm, bm), pl.ds(c * bn, bn)]
            o_ref[0, pl.ds(r * bm, bm), pl.ds(c * bn, bn)] = (
                blk.astype(jnp.float32) * s).astype(o_ref.dtype)


def _pick_rows_per_step(ms, bm, n_cols, budget_bytes):
    """Largest divisor of Ms whose double-buffered in+out slab fits the budget.

    fp8 input (1 B/elem) + bf16 output (2 B/elem), x2 buffers => 6 B/elem.
    """
    best = 1
    for d in range(1, ms + 1):
        if ms % d == 0 and 6 * d * bm * n_cols <= budget_bytes:
            best = d
    return best


@functools.partial(
    jax.jit, static_argnames=("block_size", "out_dtype", "vmem_budget_bytes"))
def moe_fp8_dequant(weight, scale_inv_fp8, block_size=(128, 128),
                    out_dtype=jnp.bfloat16,
                    vmem_budget_bytes=24 * 1024 * 1024):
    """Pallas equivalent of dequant_block_fp8_weight_naive (2-D or 3-D).

    weight:        [E, M, N] (or [M, N]) float8_e4m3fn, blockwise-quantized.
    scale_inv_fp8: [E, M//bm, N//bn] (or [M//bm, N//bn]) float32.
    returns:       same leading shape as weight, dtype out_dtype.
    """
    squeeze = False
    if weight.ndim == 2:
        weight = weight[None]
        scale_inv_fp8 = scale_inv_fp8[None]
        squeeze = True

    E, M, N = weight.shape
    bm, bn = block_size
    # TODO(synk): add a padded path if ragged M/N ever appear (reference assumes
    #             block-aligned shapes too).
    assert M % bm == 0 and N % bn == 0, "M/N must be multiples of block_size"
    Ms, Ns = M // bm, N // bn
    assert scale_inv_fp8.shape == (E, Ms, Ns)

    rows_per_step = _pick_rows_per_step(Ms, bm, N, vmem_budget_bytes)
    TM = rows_per_step * bm
    grid = (E, Ms // rows_per_step)

    # Flatten scales to 1-D so SMEM holds ~4*E*Ms*Ns bytes instead of the
    # heavily padded multi-D SMEM layout.
    scale_flat = scale_inv_fp8.astype(jnp.float32).reshape(-1)

    kernel = functools.partial(_dequant_kernel, bm=bm, bn=bn,
                               rows_per_step=rows_per_step, ms=Ms, ns=Ns)

    tile_bytes = TM * N * (1 + 2)            # one fp8-in + bf16-out buffer pair
    vmem_limit = int(min(max(2 * tile_bytes + (8 << 20), 24 << 20), 56 << 20))

    cost = pl.CostEstimate(
        flops=E * M * N,
        transcendentals=0,
        bytes_accessed=E * M * N * (1 + 2) + scale_flat.size * 4,
    )

    out = pl.pallas_call(
        kernel,
        out_shape=jax.ShapeDtypeStruct((E, M, N), out_dtype),
        grid_spec=pltpu.PrefetchScalarGridSpec(
            num_scalar_prefetch=1,
            grid=grid,
            in_specs=[pl.BlockSpec((1, TM, N), lambda e, i, s: (e, i, 0))],
            out_specs=pl.BlockSpec((1, TM, N), lambda e, i, s: (e, i, 0)),
        ),
        compiler_params=pltpu.CompilerParams(
            dimension_semantics=("parallel", "parallel"),
            vmem_limit_bytes=vmem_limit),
        cost_estimate=cost,
    )(scale_flat, weight)

    return out[0] if squeeze else out


class MoeFP8Matmul:
    """Thin JAX mirror of the PyTorch module's relevant surface."""

    def __init__(self, block_size=(128, 128), high_precision=jnp.bfloat16):
        self.block_size = tuple(block_size)
        self.high_precision = high_precision
        self.is_dequantized = False
        self.weight = None
        self.scale_inv_fp8 = None

    def set_weight(self, w):
        self.weight = w

    def set_scale_inv_fp8(self, s):
        self.scale_inv_fp8 = s

    def set_high_precision(self, high_precision=jnp.bfloat16):
        self.high_precision = high_precision

    def set_weight_block_size(self, block_size=(128, 128)):
        self.block_size = tuple(block_size)

    def get_dequant_weight(self):
        if self.scale_inv_fp8 is None:
            return self.weight
        return moe_fp8_dequant(self.weight, self.scale_inv_fp8,
                               block_size=self.block_size,
                               out_dtype=self.high_precision)

    def forward(self, state, expert_id, w):
        # TODO(synk): reference forward() raises NotImplementedError as well.
        raise NotImplementedError()

    def dequant_block_fp8_weight(self, layer=None):
        layer = self if layer is None else layer
        if getattr(layer, "updated_fp8_weight", False):
            return layer.weight
        out = layer.get_dequant_weight()
        layer.is_dequantized = True
        return out

    def get_dequant_weights_func(self):
        return self.dequant_block_fp8_weight


if __name__ == "__main__":
    key = jax.random.PRNGKey(0)
    kw, ks = jax.random.split(key)

    # Small MoE-like shapes consistent with block_size=(128, 128).
    E, M, N = 2, 256, 256
    bm, bn = 128, 128
    Ms, Ns = M // bm, N // bn

    w_hp = jax.random.normal(kw, (E, M, N), dtype=jnp.float32)
    weight_fp8 = w_hp.astype(jnp.float8_e4m3fn)
    scale_inv = jax.random.uniform(ks, (E, Ms, Ns), dtype=jnp.float32,
                                   minval=0.5, maxval=1.5)

    layer = MoeFP8Matmul(block_size=(bm, bn), high_precision=jnp.bfloat16)
    layer.set_weight(weight_fp8)
    layer.set_scale_inv_fp8(scale_inv)

    out = layer.dequant_block_fp8_weight()
    out = jax.block_until_ready(out)

    # Pure-JAX reference (f32 multiply, single rounding to bf16 — matches the
    # kernel; within loose tolerance of the reference's bf16*bf16 path too).
    ref3 = (weight_fp8.astype(jnp.float32).reshape(E, Ms, bm, Ns, bn)
            * scale_inv[:, :, None, :, None]).reshape(E, M, N).astype(jnp.bfloat16)

    assert out.shape == (E, M, N) and out.dtype == jnp.bfloat16
    assert jnp.allclose(out.astype(jnp.float32), ref3.astype(jnp.float32),
                        rtol=2e-2, atol=1e-2), "3-D mismatch vs reference"

    # Also exercise the 2-D (single-matrix) path of the reference function.
    out2 = jax.block_until_ready(
        moe_fp8_dequant(weight_fp8[0], scale_inv[0], block_size=(bm, bn)))
    assert out2.shape == (M, N) and out2.dtype == jnp.bfloat16
    assert jnp.allclose(out2.astype(jnp.float32),
                        ref3[0].astype(jnp.float32),
                        rtol=2e-2, atol=1e-2), "2-D mismatch vs reference"

    print("KERNEL_OK")
</pallas_src>

<mosaic_0001>
module attributes {stable_mosaic.version = 11 : i64} {
  func.func @_dequant_kernel(%arg0: i32, %arg1: i32, %arg2: memref<8xf32, #tpu.memory_space<smem>>, %arg3: memref<1x256x256xf8E4M3FN, #tpu.memory_space<vmem>>, %arg4: memref<1x256x256xbf16, #tpu.memory_space<vmem>>) attributes {dimension_semantics = [#tpu.dimension_semantics<parallel>, #tpu.dimension_semantics<parallel>], iteration_bounds = array<i64: 2, 1>, scalar_prefetch = 1 : i64, scratch_operands = 0 : i64, tpu.core_type = #tpu.core_type<tc>, window_params = [{transform_indices = @transform_0, window_bounds = array<i64: 1, 256, 256>}, {transform_indices = @transform_1, window_bounds = array<i64: 1, 256, 256>}]} {
    %c4_i32 = arith.constant 4 : i32
    %0 = arith.muli %arg0, %c4_i32 : i32
    %c4_i32_0 = arith.constant 4 : i32
    %1 = arith.muli %arg1, %c4_i32_0 : i32
    %2 = arith.addi %0, %1 : i32
    %c0_i32 = arith.constant 0 : i32
    %3 = arith.addi %2, %c0_i32 : i32
    %c0_i32_1 = arith.constant 0 : i32
    %4 = arith.addi %3, %c0_i32_1 : i32
    %5 = arith.index_cast %4 : i32 to index
    %6 = memref.load %arg2[%5] : memref<8xf32, #tpu.memory_space<smem>>
    %c0 = arith.constant 0 : index
    %c0_2 = arith.constant 0 : index
    %c0_3 = arith.constant 0 : index
    %7 = vector.load %arg3[%c0, %c0_2, %c0_3] : memref<1x256x256xf8E4M3FN, #tpu.memory_space<vmem>>, vector<1x128x128xf8E4M3FN>
    %8 = vector.shape_cast %7 : vector<1x128x128xf8E4M3FN> to vector<128x128xf8E4M3FN>
    %9 = arith.extf %8 : vector<128x128xf8E4M3FN> to vector<128x128xf32>
    %10 = vector.broadcast %6 : f32 to vector<128x128xf32>
    %11 = arith.mulf %9, %10 : vector<128x128xf32>
    %12 = arith.truncf %11 : vector<128x128xf32> to vector<128x128xbf16>
    %c0_4 = arith.constant 0 : index
    %c0_5 = arith.constant 0 : index
    %c0_6 = arith.constant 0 : index
    %13 = vector.load %arg4[%c0_4, %c0_5, %c0_6] : memref<1x256x256xbf16, #tpu.memory_space<vmem>>, vector<1x128x128xbf16>
    %14 = vector.shape_cast %13 : vector<1x128x128xbf16> to vector<128x128xbf16>
    %15 = vector.shape_cast %12 : vector<128x128xbf16> to vector<1x128x128xbf16>
    tpu.vector_store %arg4[%c0_4, %c0_5, %c0_6], %15 {strides = array<i32>} : memref<1x256x256xbf16, #tpu.memory_space<vmem>>, vector<1x128x128xbf16>,
    %c0_i32_7 = arith.constant 0 : i32
    %16 = arith.addi %2, %c0_i32_7 : i32
    %c1_i32 = arith.constant 1 : i32
    %17 = arith.addi %16, %c1_i32 : i32
    %18 = arith.index_cast %17 : i32 to index
    %19 = memref.load %arg2[%18] : memref<8xf32, #tpu.memory_space<smem>>
    %c0_8 = arith.constant 0 : index
    %c0_9 = arith.constant 0 : index
    %c128 = arith.constant 128 : index
    %20 = vector.load %arg3[%c0_8, %c0_9, %c128] : memref<1x256x256xf8E4M3FN, #tpu.memory_space<vmem>>, vector<1x128x128xf8E4M3FN>
    %21 = vector.shape_cast %20 : vector<1x128x128xf8E4M3FN> to vector<128x128xf8E4M3FN>
    %22 = arith.extf %21 : vector<128x128xf8E4M3FN> to vector<128x128xf32>
    %23 = vector.broadcast %19 : f32 to vector<128x128xf32>
    %24 = arith.mulf %22, %23 : vector<128x128xf32>
    %25 = arith.truncf %24 : vector<128x128xf32> to vector<128x128xbf16>
    %c0_10 = arith.constant 0 : index
    %c0_11 = arith.constant 0 : index
    %c128_12 = arith.constant 128 : index
    %26 = vector.load %arg4[%c0_10, %c0_11, %c128_12] : memref<1x256x256xbf16, #tpu.memory_space<vmem>>, vector<1x128x128xbf16>
    %27 = vector.shape_cast %26 : vector<1x128x128xbf16> to vector<128x128xbf16>
    %28 = vector.shape_cast %25 : vector<128x128xbf16> to vector<1x128x128xbf16>
    tpu.vector_store %arg4[%c0_10, %c0_11, %c128_12], %28 {strides = array<i32>} : memref<1x256x256xbf16, #tpu.memory_space<vmem>>, vector<1x128x128xbf16>,
    %c2_i32 = arith.constant 2 : i32
    %29 = arith.addi %2, %c2_i32 : i32
    %c0_i32_13 = arith.constant 0 : i32
    %30 = arith.addi %29, %c0_i32_13 : i32
    %31 = arith.index_cast %30 : i32 to index
    %32 = memref.load %arg2[%31] : memref<8xf32, #tpu.memory_space<smem>>
    %c0_14 = arith.constant 0 : index
    %c128_15 = arith.constant 128 : index
    %c0_16 = arith.constant 0 : index
    %33 = vector.load %arg3[%c0_14, %c128_15, %c0_16] : memref<1x256x256xf8E4M3FN, #tpu.memory_space<vmem>>, vector<1x128x128xf8E4M3FN>
    %34 = vector.shape_cast %33 : vector<1x128x128xf8E4M3FN> to vector<128x128xf8E4M3FN>
    %35 = arith.extf %34 : vector<128x128xf8E4M3FN> to vector<128x128xf32>
    %36 = vector.broadcast %32 : f32 to vector<128x128xf32>
    %37 = arith.mulf %35, %36 : vector<128x128xf32>
    %38 = arith.truncf %37 : vector<128x128xf32> to vector<128x128xbf16>
    %c0_17 = arith.constant 0 : index
    %c128_18 = arith.constant 128 : index
    %c0_19 = arith.constant 0 : index
    %39 = vector.load %arg4[%c0_17, %c128_18, %c0_19] : memref<1x256x256xbf16, #tpu.memory_space<vmem>>, vector<1x128x128xbf16>
    %40 = vector.shape_cast %39 : vector<1x128x128xbf16> to vector<128x128xbf16>
    %41 = vector.shape_cast %38 : vector<128x128xbf16> to vector<1x128x128xbf16>
    tpu.vector_store %arg4[%c0_17, %c128_18, %c0_19], %41 {strides = array<i32>} : memref<1x256x256xbf16, #tpu.memory_space<vmem>>, vector<1x128x128xbf16>,
    %c2_i32_20 = arith.constant 2 : i32
    %42 = arith.addi %2, %c2_i32_20 : i32
    %c1_i32_21 = arith.constant 1 : i32
    %43 = arith.addi %42, %c1_i32_21 : i32
    %44 = arith.index_cast %43 : i32 to index
    %45 = memref.load %arg2[%44] : memref<8xf32, #tpu.memory_space<smem>>
    %c0_22 = arith.constant 0 : index
    %c128_23 = arith.constant 128 : index
    %c128_24 = arith.constant 128 : index
    %46 = vector.load %arg3[%c0_22, %c128_23, %c128_24] : memref<1x256x256xf8E4M3FN, #tpu.memory_space<vmem>>, vector<1x128x128xf8E4M3FN>
    %47 = vector.shape_cast %46 : vector<1x128x128xf8E4M3FN> to vector<128x128xf8E4M3FN>
    %48 = arith.extf %47 : vector<128x128xf8E4M3FN> to vector<128x128xf32>
    %49 = vector.broadcast %45 : f32 to vector<128x128xf32>
    %50 = arith.mulf %48, %49 : vector<128x128xf32>
    %51 = arith.truncf %50 : vector<128x128xf32> to vector<128x128xbf16>
    %c0_25 = arith.constant 0 : index
    %c128_26 = arith.constant 128 : index
    %c128_27 = arith.constant 128 : index
    %52 = vector.load %arg4[%c0_25, %c128_26, %c128_27] : memref<1x256x256xbf16, #tpu.memory_space<vmem>>, vector<1x128x128xbf16>
    %53 = vector.shape_cast %52 : vector<1x128x128xbf16> to vector<128x128xbf16>
    %54 = vector.shape_cast %51 : vector<128x128xbf16> to vector<1x128x128xbf16>
    tpu.vector_store %arg4[%c0_25, %c128_26, %c128_27], %54 {strides = array<i32>} : memref<1x256x256xbf16, #tpu.memory_space<vmem>>, vector<1x128x128xbf16>,
    return
  }
  func.func @transform_0(%arg0: i32, %arg1: i32, %arg2: memref<8xf32, #tpu.memory_space<smem>>) -> (i32, i32, i32) {
    %c0_i32 = arith.constant 0 : i32
    %c0_i32_0 = arith.constant 0 : i32
    return %arg0, %arg1, %c0_i32 : i32, i32, i32
  }
  func.func @transform_1(%arg0: i32, %arg1: i32, %arg2: memref<8xf32, #tpu.memory_space<smem>>) -> (i32, i32, i32) {
    %c0_i32 = arith.constant 0 : i32
    %c0_i32_0 = arith.constant 0 : i32
    return %arg0, %arg1, %c0_i32 : i32, i32, i32
  }
}

</mosaic_0001>

<bundles_post_ra>
// kernel: moe_fp8_dequant.1
= control target key start
LH: loop header
LB: loop body
LE: loop exit
PB: predicated region body
PF: predicated region fallthrough
CT: control target
= control target key end

     0   :  { %s4093_s0 = inlined_call_operand.vmem [shape: f32[8], index: 0, kind: input, shape index: {}]   ;;  %s4094_s1 = inlined_call_operand.hbm [shape: f8e4m3fn[2,256,256], index: 1, kind: input, shape index: {}]   ;;  %s4095_s2 = inlined_call_operand.hbm [shape: bf16[2,256,256], index: 2, kind: output, shape index: {}]  }
   0x1   :  { %s7_s11 = sshll.u32 %s4093_s0, 4  ;;  %s8_s11 = int_to_ptr.vmem [resolvable:$true] %s7_s11 }
   0x2   :  { %s2862_s12 = scalar_lea.vmem %s8_s11, 16  ;;  %p2867_p1 = scmp.lt.s32.totalorder %s8_s11, %s8_s11 }
   0x3   :  { %p2863_p0 = scmp.ne.s32.totalorder %s8_s11, %s2862_s12  ;;  %p2868_p2 = scmp.lt.s32.totalorder %s2862_s12, %s2862_s12 }
   0x5   :  { %p2869_p3 = por %p2868_p2, %p2867_p1 }
   0x7   :  { %p2870_p4 = pnand %p2869_p3, %p2863_p0 }
   0x9   :  { %2873 = shalt.err (!%p2870_p4)  }
   0xa   :  { %s2986_s13 = smov [#allocation3]  }
   0xb   :  { %10 = dma.vmem_to_smem %s8_s11, 16, %s2986_s13, [#allocation2] }
   0xc   :  { %2952 = dma.done.wait [#allocation2], 16 }
   0xd   :  { %2953 = vsyncadd [#allocation2], 4294967280 }
   0xe   :  { %12 = sfence }
   0xf   :  { %13 = vsyncpa [#allocation5], 0 }
  0x10   :  { %15 = vsyncpa [#allocation5 + $0x1], 0 }
  0x11   :  { %16 = vsyncpa [#allocation6], 0 }
  0x12   :  { %18 = vsyncpa [#allocation6 + $0x1], 0  ;;  %s3011_s14 = smov 0   ;;  %s3013_s0 = smov 0  }
  0x13   :  { %s3015_s15 = smov 0   ;;  %s3017_s16 = smov 0  }
  0x14   :  { %s3019_s17 = smov 0   ;;  %s3021_s18 = smov 0  }
  0x15 LB: > { %s2649_s19 = sadd.s32 4294967295, %s2984_s18   ;;  %s2650_s20 = sadd.s32 4294967294, %s2984_s18   ;;  %s2984_s18 = sphi %s3021_s18, %s24_s18   ;;  %s2980_s17 = sphi %s3019_s17, %s4240_s17   ;;  %s2976_s16 = sphi %s3017_s16, %s4239_s16   ;;  %s2972_s15 = sphi %s3015_s15, %s4238_s15   ;;  %s2968_s0 = sphi %s3013_s0, %s4237_s0   ;;  %s2964_s14 = sphi %s3011_s14, %s4236_s14  }
  0x16   : > { %s36_s21 = sadd.s32 1, %s2980_s17  ;;  %s45_s22 = sadd.s32 1, %s2972_s15 }
  0x17   : > { %p38_p5 = scmp.ge.s32.totalorder %s36_s21, 2  ;;  %p52_p6 = scmp.ne.s32.totalorder %s2972_s15, %s2968_s0 }
  0x18   : > { %p53_p7 = scmp.eq.s32.totalorder %s2984_s18, 0  ;;  %p58_p8 = scmp.ne.s32.totalorder %s2968_s0, %s2964_s14 }
  0x19   : > { %s4242_s21 = smov (%p38_p5, %s36_s21), 0  ;;  %p59_p10 = scmp.eq.s32.totalorder %s2649_s19, 0 }
  0x1a   : > { %p3052_p9 = por %p53_p7, %p52_p6  ;;  %s40_s24 = ssub.s32 %s2980_s17, %s4242_s21 }
  0x1b   : > { %p84_p11 = scmp.eq.s32.totalorder %s2649_s19, 1  ;;  %p43_p12 = scmp.eq.s32.totalorder %s40_s24, 0 }
  0x1c   : > { %p3058_p13 = por %p59_p10, %p58_p8  ;;  %p90_p1 = scmp.eq.s32.totalorder %s2650_s20, 1 }
  0x1d   : > { %p3062_p0 = por %p84_p11, %p52_p6  ;;  %p2807_p4 = scmp.lt.s32.totalorder %s2984_s18, 2 }
  0x1e   : > { %s3067_s27 = scalar_select %p43_p12, %s2972_s15, %s45_s22  }
  0x1f   : > { %p3069_p2 = por %p90_p1, %p58_p8  ;;  %s110_s29 = sand.u32 1, %s2972_s15  }
  0x20   : > { %s2653_s30 = sshll.u32 %s110_s29, 7  ;;  %s2729_s3 = sshll.u32 %s2980_s17, 11 }
  0x21   : > { %s123_s6 = scalar_lea.hbm %s4094_s1, %s2729_s3  ;;  %s114_s7 = scalar_lea.vmem [#allocation4], %s2653_s30 }
  0x22   : > { %s124_s8 = sshll.u32 %s114_s7, 4  ;;  %p3082_p5 = pnand %p2807_p4, %p3052_p9  ;;  %s125_s8 = int_to_ptr.vmem [resolvable:$true] %s124_s8 }
  0x23   : > { %p2656_p6 = scmp.ge.s32.totalorder %s2984_s18, 1  ;;  %s111_s10 = scalar_lea.sflag [#allocation5], %s110_s29 }
  0x24   : > { %p2876_p7 = pneg %p3082_p5  ;;  %s2887_s11 = scalar_lea.vmem %s125_s8, 2048 }
  0x25   : > { %p2888_p8 = scmp.ne.s32.totalorder %s125_s8, %s2887_s11  ;;  %s2987_s12 = smov [#allocation4]  }
  0x26   : > { %s2892_s13 = sshll.u32 %s2987_s12, 4  ;;  %s2893_s13 = int_to_ptr.vmem [resolvable:$false] %s2892_s13 }
  0x27   : > { %p2890_p10 = pnand %p2888_p8, %p2876_p7  ;;  %s2894_s19 = scalar_lea.vmem %s2893_s13, 4096 }
  0x28   : > { %p2895_p12 = scmp.lt.s32.totalorder %s125_s8, %s2893_s13  ;;  %p2896_p1 = scmp.lt.s32.totalorder %s2894_s19, %s2887_s11 }
  0x29   : > { %p2891_p11 = pneg %p2890_p10 }
  0x2a   : > { %p2897_p3 = por %p2896_p1, %p2895_p12 }
  0x2c   : > { %p2898_p9 = pnand %p2897_p3, %p2891_p11 }
  0x2e   : > { %2901 = shalt.err (!%p2898_p9)
}
  0x2f   : > { %s2988_s20 = smov 256   ;;  %s2989_s22 = smov 16  }
  0x30   : > { %2802 = dma.hbm_to_vmem [thread:$0]  (!%p3082_p5), %s123_s6, 2048, %s125_s8, %s111_s10, %s2988_s20, %s2988_s20, %s2989_s22  }
  0x31   : > { %p132_p4 = scmp.lt.s32.totalorder %s2984_s18, 3 }
  0x33   : > { %p133_p7 = pnand %p2656_p6, %p132_p4 }
  0x34   : > { %s3095_s23 = sand.u32 (!%p133_p7), 1, %s2968_s0  }
  0x35   : > { %136 = sbr.rel (%p133_p7) target bundleno = 990 (0x3de), region = 24  ;;  %s2657_s24 = sshll.u32 (!%p133_p7), %s3095_s23, 7 }
  0x36   : > { %s139_s29 = scalar_lea.sflag (!%p133_p7), [#allocation5], %s3095_s23  ;;  %s3099_s30 = scalar_lea.vmem (!%p133_p7), [#allocation4], %s2657_s24 }
  0x3a   : > { %2955 = dma.done.wait (%p3058_p13), %s139_s29, 2048  }
  0x3b   : > { %2957 = vsyncadd (%p3058_p13), %s139_s29, 4294965248  ;;  %s3106_s3 = sshll.u32 %s2976_s16, 2  ;;  %s2658_s4 = sshll.u32 %s3095_s23, 8  ;;  %v167_v0 = vld [vmem:[%s3099_s30] sm:$0xff]  ;;  %v3114_v1 = vld [vmem:[%s3099_s30 + $0x10] sm:$0xff] }
  0x3c   : > { %s3110_s5 = sld [smem:[#allocation3 + %s3106_s3]]  ;;  %v3117_v2 = vld [vmem:[%s3099_s30 + $0x20] sm:$0xff]  ;;  %v3120_v3 = vld [vmem:[%s3099_s30 + $0x30] sm:$0xff]  ;;  %s3122_s25 = scalar_lea.vmem [#allocation7], %s2658_s4 }
  0x3d   : > { %171 = vst [vmem:[#allocation8] sm:$0xff] %v167_v0 }
  0x44   : > { %v172_v4 = vld [vmem:[#allocation8] sm:$0x3] }
  0x45   : > { %v173_v5 = vunpack.c.0.f8e4m3b11 %v172_v4 }
  0x47   : > { %v177_v6 = vand.u32 2147483647, %v173_v5  ;;  %vm179_vm0 = vcmp.ne.f32.partialorder %v173_v5, %v173_v5  ;;  %v180_v7 = vmul.f32 16.0, %v173_v5 }
  0x49   : > { %vm3124_vm1 = vcmp.gt.f32.partialorder %v177_v6, 29.0  ;;  %v3128_v9 = vsel %vm179_vm0, -0.0, %v180_v7 }
  0x4a   : > { %v182_v10 = vsel %vm3124_vm1, nan, %v3128_v9 }
  0x4b   : > { %201 = vst [vmem:[#allocation9] sm:$0xff] %v167_v0 }
  0x52   : > { %v203_v11 = vld [vmem:[#allocation9 + $0x2] sm:$0x3] }
  0x53   : > { %v204_v12 = vunpack.c.0.f8e4m3b11 %v203_v11 }
  0x55   : > { %v208_v13 = vand.u32 2147483647, %v204_v12  ;;  %vm210_vm2 = vcmp.ne.f32.partialorder %v204_v12, %v204_v12  ;;  %v211_v14 = vmul.f32 16.0, %v204_v12 }
  0x57   : > { %vm3133_vm3 = vcmp.gt.f32.partialorder %v208_v13, 29.0  ;;  %v3137_v16 = vsel %vm210_vm2, -0.0, %v211_v14 }
  0x58   : > { %v213_v17 = vsel %vm3133_vm3, nan, %v3137_v16 }
  0x59   : > { %232 = vst [vmem:[#allocation10] sm:$0xff] %v167_v0 }
  0x60   : > { %v234_v18 = vld [vmem:[#allocation10 + $0x4] sm:$0x3] }
  0x61   : > { %v235_v19 = vunpack.c.0.f8e4m3b11 %v234_v18 }
  0x63   : > { %v239_v20 = vand.u32 2147483647, %v235_v19  ;;  %vm241_vm4 = vcmp.ne.f32.partialorder %v235_v19, %v235_v19  ;;  %v242_v21 = vmul.f32 16.0, %v235_v19 }
  0x65   : > { %vm3142_vm5 = vcmp.gt.f32.partialorder %v239_v20, 29.0  ;;  %v3146_v23 = vsel %vm241_vm4, -0.0, %v242_v21 }
  0x66   : > { %v244_v24 = vsel %vm3142_vm5, nan, %v3146_v23 }
  0x67   : > { %263 = vst [vmem:[#allocation11] sm:$0xff] %v167_v0 }
  0x6e   : > { %v265_v25 = vld [vmem:[#allocation11 + $0x6] sm:$0x3] }
  0x6f   : > { %v266_v26 = vunpack.c.0.f8e4m3b11 %v265_v25 }
  0x71   : > { %v270_v27 = vand.u32 2147483647, %v266_v26  ;;  %vm272_vm6 = vcmp.ne.f32.partialorder %v266_v26, %v266_v26  ;;  %v273_v28 = vmul.f32 16.0, %v266_v26 }
  0x73   : > { %vm3151_vm7 = vcmp.gt.f32.partialorder %v270_v27, 29.0  ;;  %v3155_v30 = vsel %vm272_vm6, -0.0, %v273_v28 }
  0x74   : > { %v275_v31 = vsel %vm3151_vm7, nan, %v3155_v30 }
  0x75   : > { %294 = vst [vmem:[#allocation12] sm:$0xff] %v3114_v1 }
  0x7c   : > { %v295_v32 = vld [vmem:[#allocation12] sm:$0x3] }
  0x7d   : > { %v296_v33 = vunpack.c.0.f8e4m3b11 %v295_v32 }
  0x7f   : > { %v300_v34 = vand.u32 2147483647, %v296_v33  ;;  %vm302_vm8 = vcmp.ne.f32.partialorder %v296_v33, %v296_v33  ;;  %v303_v35 = vmul.f32 16.0, %v296_v33 }
  0x81   : > { %vm3161_vm9 = vcmp.gt.f32.partialorder %v300_v34, 29.0  ;;  %v3165_v37 = vsel %vm302_vm8, -0.0, %v303_v35 }
  0x82   : > { %v305_v38 = vsel %vm3161_vm9, nan, %v3165_v37 }
  0x83   : > { %324 = vst [vmem:[#allocation13] sm:$0xff] %v3114_v1 }
  0x8a   : > { %v326_v39 = vld [vmem:[#allocation13 + $0x2] sm:$0x3] }
  0x8b   : > { %v327_v40 = vunpack.c.0.f8e4m3b11 %v326_v39 }
  0x8d   : > { %v331_v41 = vand.u32 2147483647, %v327_v40  ;;  %vm333_vm10 = vcmp.ne.f32.partialorder %v327_v40, %v327_v40  ;;  %v334_v42 = vmul.f32 16.0, %v327_v40 }
  0x8f   : > { %vm3171_vm11 = vcmp.gt.f32.partialorder %v331_v41, 29.0  ;;  %v3175_v44 = vsel %vm333_vm10, -0.0, %v334_v42 }
  0x90   : > { %v336_v45 = vsel %vm3171_vm11, nan, %v3175_v44 }
  0x91   : > { %355 = vst [vmem:[#allocation14] sm:$0xff] %v3114_v1 }
  0x98   : > { %v357_v46 = vld [vmem:[#allocation14 + $0x4] sm:$0x3] }
  0x99   : > { %v358_v47 = vunpack.c.0.f8e4m3b11 %v357_v46 }
  0x9b   : > { %v362_v48 = vand.u32 2147483647, %v358_v47  ;;  %vm364_vm12 = vcmp.ne.f32.partialorder %v358_v47, %v358_v47  ;;  %v365_v49 = vmul.f32 16.0, %v358_v47 }
  0x9d   : > { %vm3181_vm13 = vcmp.gt.f32.partialorder %v362_v48, 29.0  ;;  %v3185_v51 = vsel %vm364_vm12, -0.0, %v365_v49 }
  0x9e   : > { %v367_v52 = vsel %vm3181_vm13, nan, %v3185_v51 }
  0x9f   : > { %386 = vst [vmem:[#allocation15] sm:$0xff] %v3114_v1 }
  0xa6   : > { %v388_v53 = vld [vmem:[#allocation15 + $0x6] sm:$0x3] }
  0xa7   : > { %v389_v54 = vunpack.c.0.f8e4m3b11 %v388_v53 }
  0xa9   : > { %v393_v55 = vand.u32 2147483647, %v389_v54  ;;  %vm395_vm14 = vcmp.ne.f32.partialorder %v389_v54, %v389_v54  ;;  %v396_v56 = vmul.f32 16.0, %v389_v54 }
  0xab   : > { %vm3191_vm15 = vcmp.gt.f32.partialorder %v393_v55, 29.0  ;;  %v3195_v58 = vsel %vm395_vm14, -0.0, %v396_v56 }
  0xac   : > { %v398_v59 = vsel %vm3191_vm15, nan, %v3195_v58 }
  0xad   : > { %417 = vst [vmem:[#allocation16] sm:$0xff] %v3117_v2 }
  0xb4   : > { %v418_v60 = vld [vmem:[#allocation16] sm:$0x3] }
  0xb5   : > { %v419_v61 = vunpack.c.0.f8e4m3b11 %v418_v60 }
  0xb7   : > { %v423_v62 = vand.u32 2147483647, %v419_v61  ;;  %vm425_vm0 = vcmp.ne.f32.partialorder %v419_v61, %v419_v61  ;;  %v426_v63 = vmul.f32 16.0, %v419_v61 }
  0xb9   : > { %vm3201_vm2 = vcmp.gt.f32.partialorder %v423_v62, 29.0  ;;  %v3205_v1 = vsel %vm425_vm0, -0.0, %v426_v63 }
  0xba   : > { %v428_v4 = vsel %vm3201_vm2, nan, %v3205_v1 }
  0xbb   : > { %447 = vst [vmem:[#allocation17] sm:$0xff] %v3117_v2 }
  0xc2   : > { %v449_v5 = vld [vmem:[#allocation17 + $0x2] sm:$0x3] }
  0xc3   : > { %v450_v6 = vunpack.c.0.f8e4m3b11 %v449_v5 }
  0xc5   : > { %v454_v7 = vand.u32 2147483647, %v450_v6  ;;  %vm456_vm4 = vcmp.ne.f32.partialorder %v450_v6, %v450_v6  ;;  %v457_v11 = vmul.f32 16.0, %v450_v6 }
  0xc7   : > { %vm3211_vm6 = vcmp.gt.f32.partialorder %v454_v7, 29.0  ;;  %v3215_v13 = vsel %vm456_vm4, -0.0, %v457_v11 }
  0xc8   : > { %v459_v14 = vsel %vm3211_vm6, nan, %v3215_v13 }
  0xc9   : > { %478 = vst [vmem:[#allocation18] sm:$0xff] %v3117_v2 }
  0xd0   : > { %v480_v18 = vld [vmem:[#allocation18 + $0x4] sm:$0x3] }
  0xd1   : > { %v481_v19 = vunpack.c.0.f8e4m3b11 %v480_v18 }
  0xd3   : > { %v485_v20 = vand.u32 2147483647, %v481_v19  ;;  %vm487_vm8 = vcmp.ne.f32.partialorder %v481_v19, %v481_v19  ;;  %v488_v21 = vmul.f32 16.0, %v481_v19 }
  0xd5   : > { %vm3221_vm10 = vcmp.gt.f32.partialorder %v485_v20, 29.0  ;;  %v3225_v26 = vsel %vm487_vm8, -0.0, %v488_v21 }
  0xd6   : > { %v490_v27 = vsel %vm3221_vm10, nan, %v3225_v26 }
  0xd7   : > { %509 = vst [vmem:[#allocation19] sm:$0xff] %v3117_v2 }
  0xde   : > { %v511_v28 = vld [vmem:[#allocation19 + $0x6] sm:$0x3] }
  0xdf   : > { %v512_v32 = vunpack.c.0.f8e4m3b11 %v511_v28 }
  0xe1   : > { %v516_v33 = vand.u32 2147483647, %v512_v32  ;;  %vm518_vm12 = vcmp.ne.f32.partialorder %v512_v32, %v512_v32  ;;  %v519_v34 = vmul.f32 16.0, %v512_v32 }
  0xe3   : > { %vm3231_vm14 = vcmp.gt.f32.partialorder %v516_v33, 29.0  ;;  %v3235_v39 = vsel %vm518_vm12, -0.0, %v519_v34 }
  0xe4   : > { %v521_v40 = vsel %vm3231_vm14, nan, %v3235_v39 }
  0xe5   : > { %540 = vst [vmem:[#allocation20] sm:$0xff] %v3120_v3 }
  0xec   : > { %v541_v41 = vld [vmem:[#allocation20] sm:$0x3] }
  0xed   : > { %v542_v42 = vunpack.c.0.f8e4m3b11 %v541_v41 }
  0xef   : > { %v546_v2 = vand.u32 2147483647, %v542_v42  ;;  %vm548_vm0 = vcmp.ne.f32.partialorder %v542_v42, %v542_v42  ;;  %v549_v46 = vmul.f32 16.0, %v542_v42 }
  0xf1   : > { %vm3241_vm4 = vcmp.gt.f32.partialorder %v546_v2, 29.0  ;;  %v3245_v48 = vsel %vm548_vm0, -0.0, %v549_v46 }
  0xf2   : > { %v551_v49 = vsel %vm3241_vm4, nan, %v3245_v48 }
  0xf3   : > { %570 = vst [vmem:[#allocation21] sm:$0xff] %v3120_v3 }
  0xfa   : > { %v572_v53 = vld [vmem:[#allocation21 + $0x2] sm:$0x3] }
  0xfb   : > { %v573_v54 = vunpack.c.0.f8e4m3b11 %v572_v53 }
  0xfd   : > { %v577_v55 = vand.u32 2147483647, %v573_v54  ;;  %vm579_vm8 = vcmp.ne.f32.partialorder %v573_v54, %v573_v54  ;;  %v580_v56 = vmul.f32 16.0, %v573_v54 }
  0xff   : > { %vm3251_vm12 = vcmp.gt.f32.partialorder %v577_v55, 29.0  ;;  %v581_v61 = vsel %vm579_vm8, -0.0, %v580_v56 }
 0x100   : > { %v582_v62 = vsel %vm3251_vm12, nan, %v581_v61 }
 0x101   : > { %601 = vst [vmem:[#allocation22] sm:$0xff] %v3120_v3 }
 0x108   : > { %v603_v63 = vld [vmem:[#allocation22 + $0x4] sm:$0x3] }
 0x109   : > { %v604_v5 = vunpack.c.0.f8e4m3b11 %v603_v63 }
 0x10b   : > { %v608_v6 = vand.u32 2147483647, %v604_v5  ;;  %vm610_vm0 = vcmp.ne.f32.partialorder %v604_v5, %v604_v5  ;;  %v611_v7 = vmul.f32 16.0, %v604_v5 }
 0x10d   : > { %vm3258_vm4 = vcmp.gt.f32.partialorder %v608_v6, 29.0  ;;  %v612_v18 = vsel %vm610_vm0, -0.0, %v611_v7 }
 0x10e   : > { %v613_v19 = vsel %vm3258_vm4, nan, %v612_v18 }
 0x10f   : > { %632 = vst [vmem:[#allocation23] sm:$0xff] %v3120_v3  ;;  %v663_v3 = vstv %s3110_s5  ;;  %s760_s6 = sadd.s32 1, %s3106_s3  ;;  %v3274_v42 = vld [vmem:[%s3099_s30 + $0x8] sm:$0xff]  ;;  %v3277_v2 = vld [vmem:[%s3099_s30 + $0x18] sm:$0xff] }
 0x110   : > { %v3280_v46 = vld [vmem:[%s3099_s30 + $0x28] sm:$0xff]  ;;  %v664_v53 = vmul.f32 %v663_v3, %v182_v10  ;;  %v665_v54 = vmul.f32 %v663_v3, %v213_v17  ;;  %v666_v55 = vmul.f32 %v663_v3, %v244_v24  ;;  %v667_v56 = vmul.f32 %v663_v3, %v275_v31  ;;  %s3298_s7 = sld [smem:[#allocation3 + %s760_s6]]  ;;  %v3301_v8 = vld [vmem:[%s3099_s30 + $0x38] sm:$0xff] }
 0x111   : > { %v668_v9 = vmul.f32 %v663_v3, %v305_v38  ;;  %v669_v10 = vmul.f32 %v663_v3, %v336_v45  ;;  %v670_v15 = vmul.f32 %v663_v3, %v367_v52  ;;  %v671_v16 = vmul.f32 %v663_v3, %v398_v59 }
 0x112   : > { %v2730_v17 = vpack.c.bf16 %v664_v53, %v664_v53  ;;  %v2731_v22 = vpack.c.bf16 %v665_v54, %v665_v54  ;;  %v2732_v23 = vpack.c.bf16 %v666_v55, %v666_v55  ;;  %v2733_v24 = vpack.c.bf16 %v667_v56, %v667_v56 }
 0x113   : > { %v2734_v29 = vpack.c.bf16 %v668_v9, %v668_v9  ;;  %v2735_v30 = vpack.c.bf16 %v669_v10, %v669_v10  ;;  %v2736_v31 = vpack.c.bf16 %v670_v15, %v670_v15  ;;  %v2737_v36 = vpack.c.bf16 %v671_v16, %v671_v16 }
 0x114   : > { %744 = vst [vmem:[%s3122_s25] sm:$0xf] %v2730_v17  ;;  %745 = vst [vmem:[%s3122_s25 + $0x8] sm:$0xf] %v2731_v22  ;;  %v672_v37 = vmul.f32 %v663_v3, %v428_v4  ;;  %v673_v38 = vmul.f32 %v663_v3, %v459_v14  ;;  %v674_v43 = vmul.f32 %v663_v3, %v490_v27 }
 0x115   : > { %746 = vst [vmem:[%s3122_s25 + $0x10] sm:$0xf] %v2732_v23  ;;  %747 = vst [vmem:[%s3122_s25 + $0x18] sm:$0xf] %v2733_v24  ;;  %v675_v44 = vmul.f32 %v663_v3, %v521_v40  ;;  %v676_v45 = vmul.f32 %v663_v3, %v551_v49  ;;  %v677_v50 = vmul.f32 %v663_v3, %v582_v62 }
 0x116   : > { %v634_v20 = vld [vmem:[#allocation23 + $0x6] sm:$0x3]  ;;  %748 = vst [vmem:[%s3122_s25 + $0x20] sm:$0xf] %v2734_v29  ;;  %749 = vst [vmem:[%s3122_s25 + $0x28] sm:$0xf] %v2735_v30  ;;  %v678_v51 = vmul.f32 %v663_v3, %v613_v19  ;;  %v2738_v57 = vpack.c.bf16 %v672_v37, %v672_v37  ;;  %v2739_v58 = vpack.c.bf16 %v673_v38, %v673_v38 }
 0x117   : > { %v635_v21 = vunpack.c.0.f8e4m3b11 %v634_v20  ;;  %750 = vst [vmem:[%s3122_s25 + $0x30] sm:$0xf] %v2736_v31  ;;  %751 = vst [vmem:[%s3122_s25 + $0x38] sm:$0xf] %v2737_v36  ;;  %v2740_v59 = vpack.c.bf16 %v674_v43, %v674_v43  ;;  %v2741_v0 = vpack.c.bf16 %v675_v44, %v675_v44  ;;  %v2742_v1 = vpack.c.bf16 %v676_v45, %v676_v45 }
 0x118   : > { %v2743_v4 = vpack.c.bf16 %v677_v50, %v677_v50  ;;  %v2744_v12 = vpack.c.bf16 %v678_v51, %v678_v51  ;;  %752 = vst [vmem:[%s3122_s25 + $0x40] sm:$0xf] %v2738_v57  ;;  %753 = vst [vmem:[%s3122_s25 + $0x48] sm:$0xf] %v2739_v58 }
 0x119   : > { %v639_v28 = vand.u32 2147483647, %v635_v21  ;;  %vm641_vm8 = vcmp.ne.f32.partialorder %v635_v21, %v635_v21  ;;  %v642_v32 = vmul.f32 16.0, %v635_v21  ;;  %754 = vst [vmem:[%s3122_s25 + $0x50] sm:$0xf] %v2740_v59 }
 0x11a   : > { %755 = vst [vmem:[%s3122_s25 + $0x58] sm:$0xf] %v2741_v0  ;;  %756 = vst [vmem:[%s3122_s25 + $0x60] sm:$0xf] %v2742_v1 }
 0x11b   : > { %vm3265_vm12 = vcmp.gt.f32.partialorder %v639_v28, 29.0  ;;  %v643_v34 = vsel %vm641_vm8, -0.0, %v642_v32  ;;  %757 = vst [vmem:[%s3122_s25 + $0x68] sm:$0xf] %v2743_v4  ;;  %758 = vst [vmem:[%s3122_s25 + $0x70] sm:$0xf] %v2744_v12 }
 0x11c   : > { %v644_v41 = vsel %vm3265_vm12, nan, %v643_v34 }
 0x11d   : > { %v679_v52 = vmul.f32 %v663_v3, %v644_v41 }
 0x11f   : > { %v2745_v13 = vpack.c.bf16 %v679_v52, %v679_v52 }
 0x121   : > { %759 = vst [vmem:[%s3122_s25 + $0x78] sm:$0xf] %v2745_v13 }
 0x122   : > { %766 = vst [vmem:[#allocation24] sm:$0xff] %v3274_v42 }
 0x129   : > { %v767_v14 = vld [vmem:[#allocation24] sm:$0x3] }
 0x12a   : > { %v768_v25 = vunpack.c.0.f8e4m3b11 %v767_v14 }
 0x12c   : > { %v772_v26 = vand.u32 2147483647, %v768_v25  ;;  %vm774_vm3 = vcmp.ne.f32.partialorder %v768_v25, %v768_v25  ;;  %v775_v27 = vmul.f32 16.0, %v768_v25 }
 0x12e   : > { %vm3356_vm5 = vcmp.gt.f32.partialorder %v772_v26, 29.0  ;;  %v3360_v39 = vsel %vm774_vm3, -0.0, %v775_v27 }
 0x12f   : > { %v777_v40 = vsel %vm3356_vm5, nan, %v3360_v39 }
 0x130   : > { %796 = vst [vmem:[#allocation25] sm:$0xff] %v3274_v42 }
 0x137   : > { %v798_v47 = vld [vmem:[#allocation25 + $0x2] sm:$0x3] }
 0x138   : > { %v799_v48 = vunpack.c.0.f8e4m3b11 %v798_v47 }
 0x13a   : > { %v803_v49 = vand.u32 2147483647, %v799_v48  ;;  %vm805_vm7 = vcmp.ne.f32.partialorder %v799_v48, %v799_v48  ;;  %v806_v60 = vmul.f32 16.0, %v799_v48 }
 0x13c   : > { %vm3366_vm9 = vcmp.gt.f32.partialorder %v803_v49, 29.0  ;;  %v3370_v62 = vsel %vm805_vm7, -0.0, %v806_v60 }
 0x13d   : > { %v808_v63 = vsel %vm3366_vm9, nan, %v3370_v62 }
 0x13e   : > { %827 = vst [vmem:[#allocation26] sm:$0xff] %v3274_v42 }
 0x145   : > { %v829_v5 = vld [vmem:[#allocation26 + $0x4] sm:$0x3] }
 0x146   : > { %v830_v6 = vunpack.c.0.f8e4m3b11 %v829_v5 }
 0x148   : > { %v834_v7 = vand.u32 2147483647, %v830_v6  ;;  %vm836_vm11 = vcmp.ne.f32.partialorder %v830_v6, %v830_v6  ;;  %v837_v11 = vmul.f32 16.0, %v830_v6 }
 0x14a   : > { %vm3376_vm13 = vcmp.gt.f32.partialorder %v834_v7, 29.0  ;;  %v3380_v19 = vsel %vm836_vm11, -0.0, %v837_v11 }
 0x14b   : > { %v839_v20 = vsel %vm3376_vm13, nan, %v3380_v19 }
 0x14c   : > { %858 = vst [vmem:[#allocation27] sm:$0xff] %v3274_v42 }
 0x153   : > { %v860_v21 = vld [vmem:[#allocation27 + $0x6] sm:$0x3] }
 0x154   : > { %v861_v28 = vunpack.c.0.f8e4m3b11 %v860_v21 }
 0x156   : > { %v865_v32 = vand.u32 2147483647, %v861_v28  ;;  %vm867_vm15 = vcmp.ne.f32.partialorder %v861_v28, %v861_v28  ;;  %v868_v33 = vmul.f32 16.0, %v861_v28 }
 0x158   : > { %vm3386_vm2 = vcmp.gt.f32.partialorder %v865_v32, 29.0  ;;  %v3390_v41 = vsel %vm867_vm15, -0.0, %v868_v33 }
 0x159   : > { %v870_v3 = vsel %vm3386_vm2, nan, %v3390_v41 }
 0x15a   : > { %889 = vst [vmem:[#allocation28] sm:$0xff] %v3277_v2 }
 0x161   : > { %v890_v53 = vld [vmem:[#allocation28] sm:$0x3] }
 0x162   : > { %v891_v54 = vunpack.c.0.f8e4m3b11 %v890_v53 }
 0x164   : > { %v895_v42 = vand.u32 2147483647, %v891_v54  ;;  %vm897_vm6 = vcmp.ne.f32.partialorder %v891_v54, %v891_v54  ;;  %v898_v55 = vmul.f32 16.0, %v891_v54 }
 0x166   : > { %vm3396_vm10 = vcmp.gt.f32.partialorder %v895_v42, 29.0  ;;  %v3400_v9 = vsel %vm897_vm6, -0.0, %v898_v55 }
 0x167   : > { %v900_v10 = vsel %vm3396_vm10, nan, %v3400_v9 }
 0x168   : > { %919 = vst [vmem:[#allocation29] sm:$0xff] %v3277_v2 }
 0x16f   : > { %v921_v15 = vld [vmem:[#allocation29 + $0x2] sm:$0x3] }
 0x170   : > { %v922_v16 = vunpack.c.0.f8e4m3b11 %v921_v15 }
 0x172   : > { %v926_v17 = vand.u32 2147483647, %v922_v16  ;;  %vm928_vm14 = vcmp.ne.f32.partialorder %v922_v16, %v922_v16  ;;  %v929_v22 = vmul.f32 16.0, %v922_v16 }
 0x174   : > { %vm3406_vm4 = vcmp.gt.f32.partialorder %v926_v17, 29.0  ;;  %v3410_v24 = vsel %vm928_vm14, -0.0, %v929_v22 }
 0x175   : > { %v931_v29 = vsel %vm3406_vm4, nan, %v3410_v24 }
 0x176   : > { %950 = vst [vmem:[#allocation30] sm:$0xff] %v3277_v2 }
 0x17d   : > { %v952_v30 = vld [vmem:[#allocation30 + $0x4] sm:$0x3] }
 0x17e   : > { %v953_v31 = vunpack.c.0.f8e4m3b11 %v952_v30 }
 0x180   : > { %v957_v36 = vand.u32 2147483647, %v953_v31  ;;  %vm959_vm0 = vcmp.ne.f32.partialorder %v953_v31, %v953_v31  ;;  %v960_v37 = vmul.f32 16.0, %v953_v31 }
 0x182   : > { %vm3416_vm8 = vcmp.gt.f32.partialorder %v957_v36, 29.0  ;;  %v3420_v43 = vsel %vm959_vm0, -0.0, %v960_v37 }
 0x183   : > { %v962_v44 = vsel %vm3416_vm8, nan, %v3420_v43 }
 0x184   : > { %981 = vst [vmem:[#allocation31] sm:$0xff] %v3277_v2 }
 0x18b   : > { %v983_v45 = vld [vmem:[#allocation31 + $0x6] sm:$0x3] }
 0x18c   : > { %v984_v50 = vunpack.c.0.f8e4m3b11 %v983_v45 }
 0x18e   : > { %v988_v51 = vand.u32 2147483647, %v984_v50  ;;  %vm990_vm12 = vcmp.ne.f32.partialorder %v984_v50, %v984_v50  ;;  %v991_v52 = vmul.f32 16.0, %v984_v50 }
 0x190   : > { %vm3426_vm1 = vcmp.gt.f32.partialorder %v988_v51, 29.0  ;;  %v3430_v58 = vsel %vm990_vm12, -0.0, %v991_v52 }
 0x191   : > { %v993_v59 = vsel %vm3426_vm1, nan, %v3430_v58 }
 0x192   : > { %1012 = vst [vmem:[#allocation32] sm:$0xff] %v3280_v46 }
 0x199   : > { %v1013_v0 = vld [vmem:[#allocation32] sm:$0x3] }
 0x19a   : > { %v1014_v1 = vunpack.c.0.f8e4m3b11 %v1013_v0 }
 0x19c   : > { %v1018_v2 = vand.u32 2147483647, %v1014_v1  ;;  %vm1020_vm3 = vcmp.ne.f32.partialorder %v1014_v1, %v1014_v1  ;;  %v1021_v4 = vmul.f32 16.0, %v1014_v1 }
 0x19e   : > { %vm3436_vm7 = vcmp.gt.f32.partialorder %v1018_v2, 29.0  ;;  %v3440_v13 = vsel %vm1020_vm3, -0.0, %v1021_v4 }
 0x19f   : > { %v1023_v14 = vsel %vm3436_vm7, nan, %v3440_v13 }
 0x1a0   : > { %1042 = vst [vmem:[#allocation33] sm:$0xff] %v3280_v46 }
 0x1a7   : > { %v1044_v25 = vld [vmem:[#allocation33 + $0x2] sm:$0x3] }
 0x1a8   : > { %v1045_v26 = vunpack.c.0.f8e4m3b11 %v1044_v25 }
 0x1aa   : > { %v1049_v27 = vand.u32 2147483647, %v1045_v26  ;;  %vm1051_vm11 = vcmp.ne.f32.partialorder %v1045_v26, %v1045_v26  ;;  %v1052_v47 = vmul.f32 16.0, %v1045_v26 }
 0x1ac   : > { %vm3446_vm15 = vcmp.gt.f32.partialorder %v1049_v27, 29.0  ;;  %v3450_v49 = vsel %vm1051_vm11, -0.0, %v1052_v47 }
 0x1ad   : > { %v1054_v60 = vsel %vm3446_vm15, nan, %v3450_v49 }
 0x1ae   : > { %1073 = vst [vmem:[#allocation34] sm:$0xff] %v3280_v46 }
 0x1b5   : > { %v1075_v5 = vld [vmem:[#allocation34 + $0x4] sm:$0x3] }
 0x1b6   : > { %v1076_v6 = vunpack.c.0.f8e4m3b11 %v1075_v5 }
 0x1b8   : > { %v1080_v7 = vand.u32 2147483647, %v1076_v6  ;;  %vm1082_vm6 = vcmp.ne.f32.partialorder %v1076_v6, %v1076_v6  ;;  %v1083_v11 = vmul.f32 16.0, %v1076_v6 }
 0x1ba   : > { %vm3456_vm14 = vcmp.gt.f32.partialorder %v1080_v7, 29.0  ;;  %v3460_v28 = vsel %vm1082_vm6, -0.0, %v1083_v11 }
 0x1bb   : > { %v1085_v32 = vsel %vm3456_vm14, nan, %v3460_v28 }
 0x1bc   : > { %1104 = vst [vmem:[#allocation35] sm:$0xff] %v3280_v46 }
 0x1c3   : > { %v1106_v33 = vld [vmem:[#allocation35 + $0x6] sm:$0x3] }
 0x1c4   : > { %v1107_v53 = vunpack.c.0.f8e4m3b11 %v1106_v33 }
 0x1c6   : > { %v1111_v54 = vand.u32 2147483647, %v1107_v53  ;;  %vm1113_vm0 = vcmp.ne.f32.partialorder %v1107_v53, %v1107_v53  ;;  %v1114_v42 = vmul.f32 16.0, %v1107_v53 }
 0x1c8   : > { %vm3466_vm12 = vcmp.gt.f32.partialorder %v1111_v54, 29.0  ;;  %v3470_v15 = vsel %vm1113_vm0, -0.0, %v1114_v42 }
 0x1c9   : > { %v1116_v16 = vsel %vm3466_vm12, nan, %v3470_v15 }
 0x1ca   : > { %1135 = vst [vmem:[#allocation36] sm:$0xff] %v3301_v8 }
 0x1d1   : > { %v1136_v17 = vld [vmem:[#allocation36] sm:$0x3] }
 0x1d2   : > { %v1137_v22 = vunpack.c.0.f8e4m3b11 %v1136_v17 }
 0x1d4   : > { %v1141_v46 = vand.u32 2147483647, %v1137_v22  ;;  %vm1143_vm3 = vcmp.ne.f32.partialorder %v1137_v22, %v1137_v22  ;;  %v1144_v30 = vmul.f32 16.0, %v1137_v22 }
 0x1d6   : > { %vm3476_vm11 = vcmp.gt.f32.partialorder %v1141_v46, 29.0  ;;  %v3480_v36 = vsel %vm1143_vm3, -0.0, %v1144_v30 }
 0x1d7   : > { %v1146_v37 = vsel %vm3476_vm11, nan, %v3480_v36 }
 0x1d8   : > { %1165 = vst [vmem:[#allocation37] sm:$0xff] %v3301_v8 }
 0x1df   : > { %v1167_v45 = vld [vmem:[#allocation37 + $0x2] sm:$0x3] }
 0x1e0   : > { %v1168_v50 = vunpack.c.0.f8e4m3b11 %v1167_v45 }
 0x1e2   : > { %v1172_v51 = vand.u32 2147483647, %v1168_v50  ;;  %vm1174_vm6 = vcmp.ne.f32.partialorder %v1168_v50, %v1168_v50  ;;  %v1175_v52 = vmul.f32 16.0, %v1168_v50 }
 0x1e4   : > { %vm3486_vm0 = vcmp.gt.f32.partialorder %v1172_v51, 29.0  ;;  %v1176_v1 = vsel %vm1174_vm6, -0.0, %v1175_v52 }
 0x1e5   : > { %v1177_v2 = vsel %vm3486_vm0, nan, %v1176_v1 }
 0x1e6   : > { %1196 = vst [vmem:[#allocation38] sm:$0xff] %v3301_v8 }
 0x1ed   : > { %v1198_v4 = vld [vmem:[#allocation38 + $0x4] sm:$0x3] }
 0x1ee   : > { %v1199_v25 = vunpack.c.0.f8e4m3b11 %v1198_v4 }
 0x1f0   : > { %v1203_v26 = vand.u32 2147483647, %v1199_v25  ;;  %vm1205_vm3 = vcmp.ne.f32.partialorder %v1199_v25, %v1199_v25  ;;  %v1206_v27 = vmul.f32 16.0, %v1199_v25 }
 0x1f2   : > { %vm3493_vm11 = vcmp.gt.f32.partialorder %v1203_v26, 29.0  ;;  %v1207_v5 = vsel %vm1205_vm3, -0.0, %v1206_v27 }
 0x1f3   : > { %v1208_v6 = vsel %vm3493_vm11, nan, %v1207_v5 }
 0x1f4   : > { %1227 = vst [vmem:[#allocation39] sm:$0xff] %v3301_v8  ;;  %v1258_v8 = vstv %s3298_s7  ;;  %s1355_s8 = sadd.s32 2, %s3106_s3  ;;  %v3509_v22 = vld [vmem:[%s3099_s30 + $0x40] sm:$0xff]  ;;  %v3512_v46 = vld [vmem:[%s3099_s30 + $0x50] sm:$0xff] }
 0x1f5   : > { %v3515_v30 = vld [vmem:[%s3099_s30 + $0x60] sm:$0xff]  ;;  %v1259_v45 = vmul.f32 %v1258_v8, %v777_v40  ;;  %v1260_v50 = vmul.f32 %v1258_v8, %v808_v63  ;;  %v1261_v51 = vmul.f32 %v1258_v8, %v839_v20  ;;  %v1262_v52 = vmul.f32 %v1258_v8, %v870_v3  ;;  %s3533_s9 = sld [smem:[#allocation3 + %s1355_s8]]  ;;  %v3536_v35 = vld [vmem:[%s3099_s30 + $0x70] sm:$0xff] }
 0x1f6   : > { %v1263_v39 = vmul.f32 %v1258_v8, %v900_v10  ;;  %v1264_v40 = vmul.f32 %v1258_v8, %v931_v29  ;;  %v1265_v61 = vmul.f32 %v1258_v8, %v962_v44  ;;  %v1266_v62 = vmul.f32 %v1258_v8, %v993_v59 }
 0x1f7   : > { %v2746_v63 = vpack.c.bf16 %v1259_v45, %v1259_v45  ;;  %v2747_v18 = vpack.c.bf16 %v1260_v50, %v1260_v50  ;;  %v2748_v19 = vpack.c.bf16 %v1261_v51, %v1261_v51  ;;  %v2749_v20 = vpack.c.bf16 %v1262_v52, %v1262_v52 }
 0x1f8   : > { %v2750_v34 = vpack.c.bf16 %v1263_v39, %v1263_v39  ;;  %v2751_v41 = vpack.c.bf16 %v1264_v40, %v1264_v40  ;;  %v2752_v3 = vpack.c.bf16 %v1265_v61, %v1265_v61  ;;  %v2753_v56 = vpack.c.bf16 %v1266_v62, %v1266_v62 }
 0x1f9   : > { %1339 = vst [vmem:[%s3122_s25 + $0x4] sm:$0xf] %v2746_v63  ;;  %1340 = vst [vmem:[%s3122_s25 + $0xc] sm:$0xf] %v2747_v18  ;;  %v1267_v9 = vmul.f32 %v1258_v8, %v1023_v14  ;;  %v1268_v10 = vmul.f32 %v1258_v8, %v1054_v60  ;;  %v1269_v23 = vmul.f32 %v1258_v8, %v1085_v32 }
 0x1fa   : > { %1341 = vst [vmem:[%s3122_s25 + $0x14] sm:$0xf] %v2748_v19  ;;  %1342 = vst [vmem:[%s3122_s25 + $0x1c] sm:$0xf] %v2749_v20  ;;  %v1270_v24 = vmul.f32 %v1258_v8, %v1116_v16  ;;  %v1271_v29 = vmul.f32 %v1258_v8, %v1146_v37  ;;  %v1272_v38 = vmul.f32 %v1258_v8, %v1177_v2 }
 0x1fb   : > { %v1229_v7 = vld [vmem:[#allocation39 + $0x6] sm:$0x3]  ;;  %1343 = vst [vmem:[%s3122_s25 + $0x24] sm:$0xf] %v2750_v34  ;;  %1344 = vst [vmem:[%s3122_s25 + $0x2c] sm:$0xf] %v2751_v41  ;;  %v1273_v43 = vmul.f32 %v1258_v8, %v1208_v6  ;;  %v2754_v57 = vpack.c.bf16 %v1267_v9, %v1267_v9  ;;  %v2755_v58 = vpack.c.bf16 %v1268_v10, %v1268_v10 }
 0x1fc   : > { %v1230_v11 = vunpack.c.0.f8e4m3b11 %v1229_v7  ;;  %1345 = vst [vmem:[%s3122_s25 + $0x34] sm:$0xf] %v2752_v3  ;;  %1346 = vst [vmem:[%s3122_s25 + $0x3c] sm:$0xf] %v2753_v56  ;;  %v2756_v59 = vpack.c.bf16 %v1269_v23, %v1269_v23  ;;  %v2757_v12 = vpack.c.bf16 %v1270_v24, %v1270_v24  ;;  %v2758_v13 = vpack.c.bf16 %v1271_v29, %v1271_v29 }
 0x1fd   : > { %v2759_v14 = vpack.c.bf16 %v1272_v38, %v1272_v38  ;;  %v2760_v48 = vpack.c.bf16 %v1273_v43, %v1273_v43  ;;  %1347 = vst [vmem:[%s3122_s25 + $0x44] sm:$0xf] %v2754_v57  ;;  %1348 = vst [vmem:[%s3122_s25 + $0x4c] sm:$0xf] %v2755_v58 }
 0x1fe   : > { %v1234_v33 = vand.u32 2147483647, %v1230_v11  ;;  %vm1236_vm6 = vcmp.ne.f32.partialorder %v1230_v11, %v1230_v11  ;;  %v1237_v53 = vmul.f32 16.0, %v1230_v11  ;;  %1349 = vst [vmem:[%s3122_s25 + $0x54] sm:$0xf] %v2756_v59 }
 0x1ff   : > { %1350 = vst [vmem:[%s3122_s25 + $0x5c] sm:$0xf] %v2757_v12  ;;  %1351 = vst [vmem:[%s3122_s25 + $0x64] sm:$0xf] %v2758_v13 }
 0x200   : > { %vm3500_vm0 = vcmp.gt.f32.partialorder %v1234_v33, 29.0  ;;  %v1238_v42 = vsel %vm1236_vm6, -0.0, %v1237_v53  ;;  %1352 = vst [vmem:[%s3122_s25 + $0x6c] sm:$0xf] %v2759_v14  ;;  %1353 = vst [vmem:[%s3122_s25 + $0x74] sm:$0xf] %v2760_v48 }
 0x201   : > { %v1239_v17 = vsel %vm3500_vm0, nan, %v1238_v42 }
 0x202   : > { %v1274_v44 = vmul.f32 %v1258_v8, %v1239_v17 }
 0x204   : > { %v2761_v49 = vpack.c.bf16 %v1274_v44, %v1274_v44 }
 0x206   : > { %1354 = vst [vmem:[%s3122_s25 + $0x7c] sm:$0xf] %v2761_v49 }
 0x207   : > { %1361 = vst [vmem:[#allocation40] sm:$0xff] %v3509_v22 }
 0x20e   : > { %v1362_v60 = vld [vmem:[#allocation40] sm:$0x3] }
 0x20f   : > { %v1363_v21 = vunpack.c.0.f8e4m3b11 %v1362_v60 }
 0x211   : > { %v1367_v28 = vand.u32 2147483647, %v1363_v21  ;;  %vm1369_vm9 = vcmp.ne.f32.partialorder %v1363_v21, %v1363_v21  ;;  %v1370_v32 = vmul.f32 16.0, %v1363_v21 }
 0x213   : > { %vm3591_vm13 = vcmp.gt.f32.partialorder %v1367_v28, 29.0  ;;  %v3595_v15 = vsel %vm1369_vm9, -0.0, %v1370_v32 }
 0x214   : > { %v1372_v16 = vsel %vm3591_vm13, nan, %v3595_v15 }
 0x215   : > { %1391 = vst [vmem:[#allocation41] sm:$0xff] %v3509_v22 }
 0x21c   : > { %v1393_v31 = vld [vmem:[#allocation41 + $0x2] sm:$0x3] }
 0x21d   : > { %v1394_v36 = vunpack.c.0.f8e4m3b11 %v1393_v31 }
 0x21f   : > { %v1398_v37 = vand.u32 2147483647, %v1394_v36  ;;  %vm1400_vm2 = vcmp.ne.f32.partialorder %v1394_v36, %v1394_v36  ;;  %v1401_v0 = vmul.f32 16.0, %v1394_v36 }
 0x221   : > { %vm3601_vm10 = vcmp.gt.f32.partialorder %v1398_v37, 29.0  ;;  %v3605_v2 = vsel %vm1400_vm2, -0.0, %v1401_v0 }
 0x222   : > { %v1403_v4 = vsel %vm3601_vm10, nan, %v3605_v2 }
 0x223   : > { %1422 = vst [vmem:[#allocation42] sm:$0xff] %v3509_v22 }
 0x22a   : > { %v1424_v25 = vld [vmem:[#allocation42 + $0x4] sm:$0x3] }
 0x22b   : > { %v1425_v26 = vunpack.c.0.f8e4m3b11 %v1424_v25 }
 0x22d   : > { %v1429_v27 = vand.u32 2147483647, %v1425_v26  ;;  %vm1431_vm4 = vcmp.ne.f32.partialorder %v1425_v26, %v1425_v26  ;;  %v1432_v47 = vmul.f32 16.0, %v1425_v26 }
 0x22f   : > { %vm3611_vm8 = vcmp.gt.f32.partialorder %v1429_v27, 29.0  ;;  %v3615_v6 = vsel %vm1431_vm4, -0.0, %v1432_v47 }
 0x230   : > { %v1434_v7 = vsel %vm3611_vm8, nan, %v3615_v6 }
 0x231   : > { %1453 = vst [vmem:[#allocation43] sm:$0xff] %v3509_v22 }
 0x238   : > { %v1455_v11 = vld [vmem:[#allocation43 + $0x6] sm:$0x3] }
 0x239   : > { %v1456_v33 = vunpack.c.0.f8e4m3b11 %v1455_v11 }
 0x23b   : > { %v1460_v53 = vand.u32 2147483647, %v1456_v33  ;;  %vm1462_vm1 = vcmp.ne.f32.partialorder %v1456_v33, %v1456_v33  ;;  %v1463_v54 = vmul.f32 16.0, %v1456_v33 }
 0x23d   : > { %vm3621_vm7 = vcmp.gt.f32.partialorder %v1460_v53, 29.0  ;;  %v3625_v17 = vsel %vm1462_vm1, -0.0, %v1463_v54 }
 0x23e   : > { %v1465_v8 = vsel %vm3621_vm7, nan, %v3625_v17 }
 0x23f   : > { %1484 = vst [vmem:[#allocation44] sm:$0xff] %v3512_v46 }
 0x246   : > { %v1485_v45 = vld [vmem:[#allocation44] sm:$0x3] }
 0x247   : > { %v1486_v50 = vunpack.c.0.f8e4m3b11 %v1485_v45 }
 0x249   : > { %v1490_v22 = vand.u32 2147483647, %v1486_v50  ;;  %vm1492_vm15 = vcmp.ne.f32.partialorder %v1486_v50, %v1486_v50  ;;  %v1493_v51 = vmul.f32 16.0, %v1486_v50 }
 0x24b   : > { %vm3631_vm14 = vcmp.gt.f32.partialorder %v1490_v22, 29.0  ;;  %v3635_v39 = vsel %vm1492_vm15, -0.0, %v1493_v51 }
 0x24c   : > { %v1495_v40 = vsel %vm3631_vm14, nan, %v3635_v39 }
 0x24d   : > { %1514 = vst [vmem:[#allocation45] sm:$0xff] %v3512_v46 }
 0x254   : > { %v1516_v61 = vld [vmem:[#allocation45 + $0x2] sm:$0x3] }
 0x255   : > { %v1517_v62 = vunpack.c.0.f8e4m3b11 %v1516_v61 }
 0x257   : > { %v1521_v63 = vand.u32 2147483647, %v1517_v62  ;;  %vm1523_vm12 = vcmp.ne.f32.partialorder %v1517_v62, %v1517_v62  ;;  %v1524_v18 = vmul.f32 16.0, %v1517_v62 }
 0x259   : > { %vm3641_vm11 = vcmp.gt.f32.partialorder %v1521_v63, 29.0  ;;  %v3645_v20 = vsel %vm1523_vm12, -0.0, %v1524_v18 }
 0x25a   : > { %v1526_v34 = vsel %vm3641_vm11, nan, %v3645_v20 }
 0x25b   : > { %1545 = vst [vmem:[#allocation46] sm:$0xff] %v3512_v46 }
 0x262   : > { %v1547_v41 = vld [vmem:[#allocation46 + $0x4] sm:$0x3] }
 0x263   : > { %v1548_v3 = vunpack.c.0.f8e4m3b11 %v1547_v41 }
 0x265   : > { %v1552_v56 = vand.u32 2147483647, %v1548_v3  ;;  %vm1554_vm3 = vcmp.ne.f32.partialorder %v1548_v3, %v1548_v3  ;;  %v1555_v9 = vmul.f32 16.0, %v1548_v3 }
 0x267   : > { %vm3651_vm6 = vcmp.gt.f32.partialorder %v1552_v56, 29.0  ;;  %v3655_v23 = vsel %vm1554_vm3, -0.0, %v1555_v9 }
 0x268   : > { %v1557_v24 = vsel %vm3651_vm6, nan, %v3655_v23 }
 0x269   : > { %1576 = vst [vmem:[#allocation47] sm:$0xff] %v3512_v46 }
 0x270   : > { %v1578_v29 = vld [vmem:[#allocation47 + $0x6] sm:$0x3] }
 0x271   : > { %v1579_v38 = vunpack.c.0.f8e4m3b11 %v1578_v29 }
 0x273   : > { %v1583_v43 = vand.u32 2147483647, %v1579_v38  ;;  %vm1585_vm0 = vcmp.ne.f32.partialorder %v1579_v38, %v1579_v38  ;;  %v1586_v44 = vmul.f32 16.0, %v1579_v38 }
 0x275   : > { %vm3661_vm5 = vcmp.gt.f32.partialorder %v1583_v43, 29.0  ;;  %v3665_v58 = vsel %vm1585_vm0, -0.0, %v1586_v44 }
 0x276   : > { %v1588_v59 = vsel %vm3661_vm5, nan, %v3665_v58 }
 0x277   : > { %1607 = vst [vmem:[#allocation48] sm:$0xff] %v3515_v30 }
 0x27e   : > { %v1608_v12 = vld [vmem:[#allocation48] sm:$0x3] }
 0x27f   : > { %v1609_v13 = vunpack.c.0.f8e4m3b11 %v1608_v12 }
 0x281   : > { %v1613_v46 = vand.u32 2147483647, %v1609_v13  ;;  %vm1615_vm9 = vcmp.ne.f32.partialorder %v1609_v13, %v1609_v13  ;;  %v1616_v14 = vmul.f32 16.0, %v1609_v13 }
 0x283   : > { %vm3671_vm2 = vcmp.gt.f32.partialorder %v1613_v46, 29.0  ;;  %v3675_v49 = vsel %vm1615_vm9, -0.0, %v1616_v14 }
 0x284   : > { %v1618_v60 = vsel %vm3671_vm2, nan, %v3675_v49 }
 0x285   : > { %1637 = vst [vmem:[#allocation49] sm:$0xff] %v3515_v30 }
 0x28c   : > { %v1639_v21 = vld [vmem:[#allocation49 + $0x2] sm:$0x3] }
 0x28d   : > { %v1640_v28 = vunpack.c.0.f8e4m3b11 %v1639_v21 }
 0x28f   : > { %v1644_v32 = vand.u32 2147483647, %v1640_v28  ;;  %vm1646_vm4 = vcmp.ne.f32.partialorder %v1640_v28, %v1640_v28  ;;  %v1647_v31 = vmul.f32 16.0, %v1640_v28 }
 0x291   : > { %vm3681_vm1 = vcmp.gt.f32.partialorder %v1644_v32, 29.0  ;;  %v3685_v37 = vsel %vm1646_vm4, -0.0, %v1647_v31 }
 0x292   : > { %v1649_v0 = vsel %vm3681_vm1, nan, %v3685_v37 }
 0x293   : > { %1668 = vst [vmem:[#allocation50] sm:$0xff] %v3515_v30 }
 0x29a   : > { %v1670_v25 = vld [vmem:[#allocation50 + $0x4] sm:$0x3] }
 0x29b   : > { %v1671_v26 = vunpack.c.0.f8e4m3b11 %v1670_v25 }
 0x29d   : > { %v1675_v27 = vand.u32 2147483647, %v1671_v26  ;;  %vm1677_vm15 = vcmp.ne.f32.partialorder %v1671_v26, %v1671_v26  ;;  %v1678_v47 = vmul.f32 16.0, %v1671_v26 }
 0x29f   : > { %vm3691_vm12 = vcmp.gt.f32.partialorder %v1675_v27, 29.0  ;;  %v3695_v33 = vsel %vm1677_vm15, -0.0, %v1678_v47 }
 0x2a0   : > { %v1680_v53 = vsel %vm3691_vm12, nan, %v3695_v33 }
 0x2a1   : > { %1699 = vst [vmem:[#allocation51] sm:$0xff] %v3515_v30 }
 0x2a8   : > { %v1701_v54 = vld [vmem:[#allocation51 + $0x6] sm:$0x3] }
 0x2a9   : > { %v1702_v45 = vunpack.c.0.f8e4m3b11 %v1701_v54 }
 0x2ab   : > { %v1706_v50 = vand.u32 2147483647, %v1702_v45  ;;  %vm1708_vm3 = vcmp.ne.f32.partialorder %v1702_v45, %v1702_v45  ;;  %v1709_v22 = vmul.f32 16.0, %v1702_v45 }
 0x2ad   : > { %vm3701_vm0 = vcmp.gt.f32.partialorder %v1706_v50, 29.0  ;;  %v3705_v61 = vsel %vm1708_vm3, -0.0, %v1709_v22 }
 0x2ae   : > { %v1711_v62 = vsel %vm3701_vm0, nan, %v3705_v61 }
 0x2af   : > { %1730 = vst [vmem:[#allocation52] sm:$0xff] %v3536_v35 }
 0x2b6   : > { %v1731_v63 = vld [vmem:[#allocation52] sm:$0x3] }
 0x2b7   : > { %v1732_v18 = vunpack.c.0.f8e4m3b11 %v1731_v63 }
 0x2b9   : > { %v1736_v30 = vand.u32 2147483647, %v1732_v18  ;;  %vm1738_vm9 = vcmp.ne.f32.partialorder %v1732_v18, %v1732_v18  ;;  %v1739_v41 = vmul.f32 16.0, %v1732_v18 }
 0x2bb   : > { %vm3711_vm4 = vcmp.gt.f32.partialorder %v1736_v30, 29.0  ;;  %v3715_v56 = vsel %vm1738_vm9, -0.0, %v1739_v41 }
 0x2bc   : > { %v1741_v9 = vsel %vm3711_vm4, nan, %v3715_v56 }
 0x2bd   : > { %1760 = vst [vmem:[#allocation53] sm:$0xff] %v3536_v35 }
 0x2c4   : > { %v1762_v29 = vld [vmem:[#allocation53 + $0x2] sm:$0x3] }
 0x2c5   : > { %v1763_v38 = vunpack.c.0.f8e4m3b11 %v1762_v29 }
 0x2c7   : > { %v1767_v43 = vand.u32 2147483647, %v1763_v38  ;;  %vm1769_vm15 = vcmp.ne.f32.partialorder %v1763_v38, %v1763_v38  ;;  %v1770_v44 = vmul.f32 16.0, %v1763_v38 }
 0x2c9   : > { %vm3721_vm3 = vcmp.gt.f32.partialorder %v1767_v43, 29.0  ;;  %v1771_v13 = vsel %vm1769_vm15, -0.0, %v1770_v44 }
 0x2ca   : > { %v1772_v46 = vsel %vm3721_vm3, nan, %v1771_v13 }
 0x2cb   : > { %1791 = vst [vmem:[#allocation54] sm:$0xff] %v3536_v35 }
 0x2d2   : > { %v1793_v14 = vld [vmem:[#allocation54 + $0x4] sm:$0x3] }
 0x2d3   : > { %v1794_v21 = vunpack.c.0.f8e4m3b11 %v1793_v14 }
 0x2d5   : > { %v1798_v28 = vand.u32 2147483647, %v1794_v21  ;;  %vm1800_vm9 = vcmp.ne.f32.partialorder %v1794_v21, %v1794_v21  ;;  %v1801_v32 = vmul.f32 16.0, %v1794_v21 }
 0x2d7   : > { %vm3728_vm4 = vcmp.gt.f32.partialorder %v1798_v28, 29.0  ;;  %v1802_v25 = vsel %vm1800_vm9, -0.0, %v1801_v32 }
 0x2d8   : > { %v1803_v26 = vsel %vm3728_vm4, nan, %v1802_v25 }
 0x2d9   : > { %1822 = vst [vmem:[#allocation55] sm:$0xff] %v3536_v35  ;;  %v1853_v35 = vstv %s3533_s9  ;;  %s1950_s10 = sadd.s32 3, %s3106_s3  ;;  %v3744_v18 = vld [vmem:[%s3099_s30 + $0x48] sm:$0xff]  ;;  %v3747_v30 = vld [vmem:[%s3099_s30 + $0x58] sm:$0xff] }
 0x2da   : > { %v3750_v41 = vld [vmem:[%s3099_s30 + $0x68] sm:$0xff]  ;;  %v1854_v29 = vmul.f32 %v1853_v35, %v1372_v16  ;;  %v1855_v38 = vmul.f32 %v1853_v35, %v1403_v4  ;;  %v1856_v43 = vmul.f32 %v1853_v35, %v1434_v7  ;;  %v1857_v44 = vmul.f32 %v1853_v35, %v1465_v8  ;;  %s3768_s11 = sld [smem:[#allocation3 + %s1950_s10]]  ;;  %v3771_v55 = vld [vmem:[%s3099_s30 + $0x78] sm:$0xff] }
 0x2db   : > { %v1858_v15 = vmul.f32 %v1853_v35, %v1495_v40  ;;  %v1859_v16 = vmul.f32 %v1853_v35, %v1526_v34  ;;  %v1860_v1 = vmul.f32 %v1853_v35, %v1557_v24  ;;  %v1861_v2 = vmul.f32 %v1853_v35, %v1588_v59 }
 0x2dc   : > { %v2762_v4 = vpack.c.bf16 %v1854_v29, %v1854_v29  ;;  %v2763_v5 = vpack.c.bf16 %v1855_v38, %v1855_v38  ;;  %v2764_v6 = vpack.c.bf16 %v1856_v43, %v1856_v43  ;;  %v2765_v7 = vpack.c.bf16 %v1857_v44, %v1857_v44 }
 0x2dd   : > { %v2766_v42 = vpack.c.bf16 %v1858_v15, %v1858_v15  ;;  %v2767_v17 = vpack.c.bf16 %v1859_v16, %v1859_v16  ;;  %v2768_v8 = vpack.c.bf16 %v1860_v1, %v1860_v1  ;;  %v2769_v52 = vpack.c.bf16 %v1861_v2, %v1861_v2 }
 0x2de   : > { %1934 = vst [vmem:[%s3122_s25 + $0x80] sm:$0xf] %v2762_v4  ;;  %1935 = vst [vmem:[%s3122_s25 + $0x88] sm:$0xf] %v2763_v5  ;;  %v1862_v39 = vmul.f32 %v1853_v35, %v1618_v60  ;;  %v1863_v40 = vmul.f32 %v1853_v35, %v1649_v0  ;;  %v1864_v19 = vmul.f32 %v1853_v35, %v1680_v53 }
 0x2df   : > { %1936 = vst [vmem:[%s3122_s25 + $0x90] sm:$0xf] %v2764_v6  ;;  %1937 = vst [vmem:[%s3122_s25 + $0x98] sm:$0xf] %v2765_v7  ;;  %v1865_v20 = vmul.f32 %v1853_v35, %v1711_v62  ;;  %v1866_v34 = vmul.f32 %v1853_v35, %v1741_v9  ;;  %v1867_v10 = vmul.f32 %v1853_v35, %v1772_v46 }
 0x2e0   : > { %v1824_v27 = vld [vmem:[#allocation55 + $0x6] sm:$0x3]  ;;  %1938 = vst [vmem:[%s3122_s25 + $0xa0] sm:$0xf] %v2766_v42  ;;  %1939 = vst [vmem:[%s3122_s25 + $0xa8] sm:$0xf] %v2767_v17  ;;  %v1868_v23 = vmul.f32 %v1853_v35, %v1803_v26  ;;  %v2770_v57 = vpack.c.bf16 %v1862_v39, %v1862_v39  ;;  %v2771_v58 = vpack.c.bf16 %v1863_v40, %v1863_v40 }
 0x2e1   : > { %v1825_v47 = vunpack.c.0.f8e4m3b11 %v1824_v27  ;;  %1940 = vst [vmem:[%s3122_s25 + $0xb0] sm:$0xf] %v2768_v8  ;;  %1941 = vst [vmem:[%s3122_s25 + $0xb8] sm:$0xf] %v2769_v52  ;;  %v2772_v59 = vpack.c.bf16 %v1864_v19, %v1864_v19  ;;  %v2773_v48 = vpack.c.bf16 %v1865_v20, %v1865_v20  ;;  %v2774_v49 = vpack.c.bf16 %v1866_v34, %v1866_v34 }
 0x2e2   : > { %v2775_v60 = vpack.c.bf16 %v1867_v10, %v1867_v10  ;;  %v2776_v36 = vpack.c.bf16 %v1868_v23, %v1868_v23  ;;  %1942 = vst [vmem:[%s3122_s25 + $0xc0] sm:$0xf] %v2770_v57  ;;  %1943 = vst [vmem:[%s3122_s25 + $0xc8] sm:$0xf] %v2771_v58 }
 0x2e3   : > { %v1829_v54 = vand.u32 2147483647, %v1825_v47  ;;  %vm1831_vm15 = vcmp.ne.f32.partialorder %v1825_v47, %v1825_v47  ;;  %v1832_v45 = vmul.f32 16.0, %v1825_v47  ;;  %1944 = vst [vmem:[%s3122_s25 + $0xd0] sm:$0xf] %v2772_v59 }
 0x2e4   : > { %1945 = vst [vmem:[%s3122_s25 + $0xd8] sm:$0xf] %v2773_v48  ;;  %1946 = vst [vmem:[%s3122_s25 + $0xe0] sm:$0xf] %v2774_v49 }
 0x2e5   : > { %vm3735_vm3 = vcmp.gt.f32.partialorder %v1829_v54, 29.0  ;;  %v1833_v22 = vsel %vm1831_vm15, -0.0, %v1832_v45  ;;  %1947 = vst [vmem:[%s3122_s25 + $0xe8] sm:$0xf] %v2775_v60  ;;  %1948 = vst [vmem:[%s3122_s25 + $0xf0] sm:$0xf] %v2776_v36 }
 0x2e6   : > { %v1834_v63 = vsel %vm3735_vm3, nan, %v1833_v22 }
 0x2e7   : > { %v1869_v24 = vmul.f32 %v1853_v35, %v1834_v63 }
 0x2e9   : > { %v2777_v37 = vpack.c.bf16 %v1869_v24, %v1869_v24 }
 0x2eb   : > { %1949 = vst [vmem:[%s3122_s25 + $0xf8] sm:$0xf] %v2777_v37 }
 0x2ec   : > { %1956 = vst [vmem:[#allocation56] sm:$0xff] %v3744_v18 }
 0x2f3   : > { %v1957_v0 = vld [vmem:[#allocation56] sm:$0x3] }
 0x2f4   : > { %v1958_v11 = vunpack.c.0.f8e4m3b11 %v1957_v0 }
 0x2f6   : > { %v1962_v33 = vand.u32 2147483647, %v1958_v11  ;;  %vm1964_vm10 = vcmp.ne.f32.partialorder %v1958_v11, %v1958_v11  ;;  %v1965_v53 = vmul.f32 16.0, %v1958_v11 }
 0x2f8   : > { %vm3826_vm8 = vcmp.gt.f32.partialorder %v1962_v33, 29.0  ;;  %v3830_v61 = vsel %vm1964_vm10, -0.0, %v1965_v53 }
 0x2f9   : > { %v1967_v62 = vsel %vm3826_vm8, nan, %v3830_v61 }
 0x2fa   : > { %1986 = vst [vmem:[#allocation57] sm:$0xff] %v3744_v18 }
 0x301   : > { %v1988_v3 = vld [vmem:[#allocation57 + $0x2] sm:$0x3] }
 0x302   : > { %v1989_v56 = vunpack.c.0.f8e4m3b11 %v1988_v3 }
 0x304   : > { %v1993_v9 = vand.u32 2147483647, %v1989_v56  ;;  %vm1995_vm7 = vcmp.ne.f32.partialorder %v1989_v56, %v1989_v56  ;;  %v1996_v12 = vmul.f32 16.0, %v1989_v56 }
 0x306   : > { %vm3836_vm14 = vcmp.gt.f32.partialorder %v1993_v9, 29.0  ;;  %v3840_v46 = vsel %vm1995_vm7, -0.0, %v1996_v12 }
 0x307   : > { %v1998_v14 = vsel %vm3836_vm14, nan, %v3840_v46 }
 0x308   : > { %2017 = vst [vmem:[#allocation58] sm:$0xff] %v3744_v18 }
 0x30f   : > { %v2019_v21 = vld [vmem:[#allocation58 + $0x4] sm:$0x3] }
 0x310   : > { %v2020_v28 = vunpack.c.0.f8e4m3b11 %v2019_v21 }
 0x312   : > { %v2024_v32 = vand.u32 2147483647, %v2020_v28  ;;  %vm2026_vm11 = vcmp.ne.f32.partialorder %v2020_v28, %v2020_v28  ;;  %v2027_v31 = vmul.f32 16.0, %v2020_v28 }
 0x314   : > { %vm3846_vm6 = vcmp.gt.f32.partialorder %v2024_v32, 29.0  ;;  %v3850_v26 = vsel %vm2026_vm11, -0.0, %v2027_v31 }
 0x315   : > { %v2029_v27 = vsel %vm3846_vm6, nan, %v3850_v26 }
 0x316   : > { %2048 = vst [vmem:[#allocation59] sm:$0xff] %v3744_v18 }
 0x31d   : > { %v2050_v47 = vld [vmem:[#allocation59 + $0x6] sm:$0x3] }
 0x31e   : > { %v2051_v54 = vunpack.c.0.f8e4m3b11 %v2050_v47 }
 0x320   : > { %v2055_v45 = vand.u32 2147483647, %v2051_v54  ;;  %vm2057_vm5 = vcmp.ne.f32.partialorder %v2051_v54, %v2051_v54  ;;  %v2058_v50 = vmul.f32 16.0, %v2051_v54 }
 0x322   : > { %vm3856_vm2 = vcmp.gt.f32.partialorder %v2055_v45, 29.0  ;;  %v3860_v63 = vsel %vm2057_vm5, -0.0, %v2058_v50 }
 0x323   : > { %v2060_v35 = vsel %vm3856_vm2, nan, %v3860_v63 }
 0x324   : > { %2079 = vst [vmem:[#allocation60] sm:$0xff] %v3747_v30 }
 0x32b   : > { %v2080_v29 = vld [vmem:[#allocation60] sm:$0x3] }
 0x32c   : > { %v2081_v38 = vunpack.c.0.f8e4m3b11 %v2080_v29 }
 0x32e   : > { %v2085_v18 = vand.u32 2147483647, %v2081_v38  ;;  %vm2087_vm1 = vcmp.ne.f32.partialorder %v2081_v38, %v2081_v38  ;;  %v2088_v43 = vmul.f32 16.0, %v2081_v38 }
 0x330   : > { %vm3866_vm12 = vcmp.gt.f32.partialorder %v2085_v18, 29.0  ;;  %v3870_v15 = vsel %vm2087_vm1, -0.0, %v2088_v43 }
 0x331   : > { %v2090_v16 = vsel %vm3866_vm12, nan, %v3870_v15 }
 0x332   : > { %2109 = vst [vmem:[#allocation61] sm:$0xff] %v3747_v30 }
 0x339   : > { %v2111_v1 = vld [vmem:[#allocation61 + $0x2] sm:$0x3] }
 0x33a   : > { %v2112_v2 = vunpack.c.0.f8e4m3b11 %v2111_v1 }
 0x33c   : > { %v2116_v4 = vand.u32 2147483647, %v2112_v2  ;;  %vm2118_vm0 = vcmp.ne.f32.partialorder %v2112_v2, %v2112_v2  ;;  %v2119_v5 = vmul.f32 16.0, %v2112_v2 }
 0x33e   : > { %vm3876_vm4 = vcmp.gt.f32.partialorder %v2116_v4, 29.0  ;;  %v3880_v7 = vsel %vm2118_vm0, -0.0, %v2119_v5 }
 0x33f   : > { %v2121_v42 = vsel %vm3876_vm4, nan, %v3880_v7 }
 0x340   : > { %2140 = vst [vmem:[#allocation62] sm:$0xff] %v3747_v30 }
 0x347   : > { %v2142_v17 = vld [vmem:[#allocation62 + $0x4] sm:$0x3] }
 0x348   : > { %v2143_v8 = vunpack.c.0.f8e4m3b11 %v2142_v17 }
 0x34a   : > { %v2147_v52 = vand.u32 2147483647, %v2143_v8  ;;  %vm2149_vm9 = vcmp.ne.f32.partialorder %v2143_v8, %v2143_v8  ;;  %v2150_v39 = vmul.f32 16.0, %v2143_v8 }
 0x34c   : > { %vm3886_vm15 = vcmp.gt.f32.partialorder %v2147_v52, 29.0  ;;  %v3890_v19 = vsel %vm2149_vm9, -0.0, %v2150_v39 }
 0x34d   : > { %v2152_v20 = vsel %vm3886_vm15, nan, %v3890_v19 }
 0x34e   : > { %2171 = vst [vmem:[#allocation63] sm:$0xff] %v3747_v30 }
 0x355   : > { %v2173_v34 = vld [vmem:[#allocation63 + $0x6] sm:$0x3] }
 0x356   : > { %v2174_v10 = vunpack.c.0.f8e4m3b11 %v2173_v34 }
 0x358   : > { %v2178_v23 = vand.u32 2147483647, %v2174_v10  ;;  %vm2180_vm3 = vcmp.ne.f32.partialorder %v2174_v10, %v2174_v10  ;;  %v2181_v24 = vmul.f32 16.0, %v2174_v10 }
 0x35a   : > { %vm3896_vm13 = vcmp.gt.f32.partialorder %v2178_v23, 29.0  ;;  %v3900_v58 = vsel %vm2180_vm3, -0.0, %v2181_v24 }
 0x35b   : > { %v2183_v59 = vsel %vm3896_vm13, nan, %v3900_v58 }
 0x35c   : > { %2202 = vst [vmem:[#allocation64] sm:$0xff] %v3750_v41 }
 0x363   : > { %v2203_v48 = vld [vmem:[#allocation64] sm:$0x3] }
 0x364   : > { %v2204_v49 = vunpack.c.0.f8e4m3b11 %v2203_v48 }
 0x366   : > { %v2208_v30 = vand.u32 2147483647, %v2204_v49  ;;  %vm2210_vm10 = vcmp.ne.f32.partialorder %v2204_v49, %v2204_v49  ;;  %v2211_v60 = vmul.f32 16.0, %v2204_v49 }
 0x368   : > { %vm3906_vm7 = vcmp.gt.f32.partialorder %v2208_v30, 29.0  ;;  %v3910_v37 = vsel %vm2210_vm10, -0.0, %v2211_v60 }
 0x369   : > { %v2213_v0 = vsel %vm3906_vm7, nan, %v3910_v37 }
 0x36a   : > { %2232 = vst [vmem:[#allocation65] sm:$0xff] %v3750_v41 }
 0x371   : > { %v2234_v11 = vld [vmem:[#allocation65 + $0x2] sm:$0x3] }
 0x372   : > { %v2235_v33 = vunpack.c.0.f8e4m3b11 %v2234_v11 }
 0x374   : > { %v2239_v53 = vand.u32 2147483647, %v2235_v33  ;;  %vm2241_vm11 = vcmp.ne.f32.partialorder %v2235_v33, %v2235_v33  ;;  %v2242_v3 = vmul.f32 16.0, %v2235_v33 }
 0x376   : > { %vm3916_vm5 = vcmp.gt.f32.partialorder %v2239_v53, 29.0  ;;  %v3920_v9 = vsel %vm2241_vm11, -0.0, %v2242_v3 }
 0x377   : > { %v2244_v12 = vsel %vm3916_vm5, nan, %v3920_v9 }
 0x378   : > { %2263 = vst [vmem:[#allocation66] sm:$0xff] %v3750_v41 }
 0x37f   : > { %v2265_v21 = vld [vmem:[#allocation66 + $0x4] sm:$0x3] }
 0x380   : > { %v2266_v28 = vunpack.c.0.f8e4m3b11 %v2265_v21 }
 0x382   : > { %v2270_v32 = vand.u32 2147483647, %v2266_v28  ;;  %vm2272_vm1 = vcmp.ne.f32.partialorder %v2266_v28, %v2266_v28  ;;  %v2273_v31 = vmul.f32 16.0, %v2266_v28 }
 0x384   : > { %vm3926_vm0 = vcmp.gt.f32.partialorder %v2270_v32, 29.0  ;;  %v3930_v54 = vsel %vm2272_vm1, -0.0, %v2273_v31 }
 0x385   : > { %v2275_v45 = vsel %vm3926_vm0, nan, %v3930_v54 }
 0x386   : > { %2294 = vst [vmem:[#allocation67] sm:$0xff] %v3750_v41 }
 0x38d   : > { %v2296_v50 = vld [vmem:[#allocation67 + $0x6] sm:$0x3] }
 0x38e   : > { %v2297_v29 = vunpack.c.0.f8e4m3b11 %v2296_v50 }
 0x390   : > { %v2301_v38 = vand.u32 2147483647, %v2297_v29  ;;  %vm2303_vm9 = vcmp.ne.f32.partialorder %v2297_v29, %v2297_v29  ;;  %v2304_v18 = vmul.f32 16.0, %v2297_v29 }
 0x392   : > { %vm3936_vm3 = vcmp.gt.f32.partialorder %v2301_v38, 29.0  ;;  %v3940_v1 = vsel %vm2303_vm9, -0.0, %v2304_v18 }
 0x393   : > { %v2306_v2 = vsel %vm3936_vm3, nan, %v3940_v1 }
 0x394   : > { %2325 = vst [vmem:[#allocation68] sm:$0xff] %v3771_v55 }
 0x39b   : > { %v2326_v4 = vld [vmem:[#allocation68] sm:$0x3] }
 0x39c   : > { %v2327_v5 = vunpack.c.0.f8e4m3b11 %v2326_v4 }
 0x39e   : > { %v2331_v41 = vand.u32 2147483647, %v2327_v5  ;;  %vm2333_vm10 = vcmp.ne.f32.partialorder %v2327_v5, %v2327_v5  ;;  %v2334_v17 = vmul.f32 16.0, %v2327_v5 }
 0x3a0   : > { %vm3946_vm11 = vcmp.gt.f32.partialorder %v2331_v41, 29.0  ;;  %v2335_v52 = vsel %vm2333_vm10, -0.0, %v2334_v17 }
 0x3a1   : > { %v2336_v39 = vsel %vm3946_vm11, nan, %v2335_v52 }
 0x3a2   : > { %2355 = vst [vmem:[#allocation69] sm:$0xff] %v3771_v55 }
 0x3a9   : > { %v2357_v34 = vld [vmem:[#allocation69 + $0x2] sm:$0x3] }
 0x3aa   : > { %v2358_v10 = vunpack.c.0.f8e4m3b11 %v2357_v34 }
 0x3ac   : > { %v2362_v23 = vand.u32 2147483647, %v2358_v10  ;;  %vm2364_vm1 = vcmp.ne.f32.partialorder %v2358_v10, %v2358_v10  ;;  %v2365_v24 = vmul.f32 16.0, %v2358_v10 }
 0x3ae   : > { %vm3953_vm9 = vcmp.gt.f32.partialorder %v2362_v23, 29.0  ;;  %v2366_v49 = vsel %vm2364_vm1, -0.0, %v2365_v24 }
 0x3af   : > { %v2367_v30 = vsel %vm3953_vm9, nan, %v2366_v49 }
 0x3b0   : > { %2386 = vst [vmem:[#allocation70] sm:$0xff] %v3771_v55 }
 0x3b7   : > { %v2388_v60 = vld [vmem:[#allocation70 + $0x4] sm:$0x3] }
 0x3b8   : > { %v2389_v11 = vunpack.c.0.f8e4m3b11 %v2388_v60 }
 0x3ba   : > { %v2393_v33 = vand.u32 2147483647, %v2389_v11  ;;  %vm2395_vm10 = vcmp.ne.f32.partialorder %v2389_v11, %v2389_v11  ;;  %v2396_v53 = vmul.f32 16.0, %v2389_v11 }
 0x3bc   : > { %vm3960_vm11 = vcmp.gt.f32.partialorder %v2393_v33, 29.0  ;;  %v2397_v21 = vsel %vm2395_vm10, -0.0, %v2396_v53 }
 0x3bd   : > { %v2398_v28 = vsel %vm3960_vm11, nan, %v2397_v21 }
 0x3be   : > { %2417 = vst [vmem:[#allocation71] sm:$0xff] %v3771_v55  ;;  %v2448_v5 = vstv %s3768_s11  ;;  %s2794_s12 = sshll.u32 %s2976_s16, 12  ;;  %s2562_s13 = sshll.u32 %s3122_s25, 4  ;;  %s4037_s13 = int_to_ptr.vmem [resolvable:$true] %s2562_s13 }
 0x3bf   : > { %v2449_v55 = vmul.f32 %v2448_v5, %v1967_v62  ;;  %v2450_v41 = vmul.f32 %v2448_v5, %v1998_v14  ;;  %v2451_v17 = vmul.f32 %v2448_v5, %v2029_v27  ;;  %v2452_v51 = vmul.f32 %v2448_v5, %v2060_v35  ;;  %s4035_s20 = scalar_lea.hbm %s4095_s2, %s2794_s12  ;;  %s2546_s22 = scalar_lea.sflag [#allocation6], %s3095_s23 }
 0x3c0   : > { %v2453_v61 = vmul.f32 %v2448_v5, %v2090_v16  ;;  %v2454_v62 = vmul.f32 %v2448_v5, %v2121_v42  ;;  %v2455_v13 = vmul.f32 %v2448_v5, %v2152_v20  ;;  %v2456_v46 = vmul.f32 %v2448_v5, %v2183_v59  ;;  %s2902_s24 = scalar_lea.vmem %s4037_s13, 4096  ;;  %s2990_s29 = smov [#allocation7]  }
 0x3c1   : > { %v2778_v14 = vpack.c.bf16 %v2449_v55, %v2449_v55  ;;  %v2779_v25 = vpack.c.bf16 %v2450_v41, %v2450_v41  ;;  %v2780_v26 = vpack.c.bf16 %v2451_v17, %v2451_v17  ;;  %v2781_v27 = vpack.c.bf16 %v2452_v51, %v2452_v51  ;;  %p2903_p13 = scmp.ne.s32.totalorder %s4037_s13, %s2902_s24  ;;  %s2906_s30 = sshll.u32 %s2990_s29, 4  ;;  %s2907_s30 = int_to_ptr.vmem [resolvable:$false] %s2906_s30 }
 0x3c2   : > { %v2782_v22 = vpack.c.bf16 %v2453_v61, %v2453_v61  ;;  %v2783_v63 = vpack.c.bf16 %v2454_v62, %v2454_v62  ;;  %v2784_v35 = vpack.c.bf16 %v2455_v13, %v2455_v13  ;;  %v2785_v44 = vpack.c.bf16 %v2456_v46, %v2456_v46  ;;  %s2908_s3 = scalar_lea.vmem %s2907_s30, 8192  ;;  %p2909_p6 = scmp.lt.s32.totalorder %s4037_s13, %s2907_s30 }
 0x3c3   : > { %2529 = vst [vmem:[%s3122_s25 + $0x84] sm:$0xf] %v2778_v14  ;;  %2530 = vst [vmem:[%s3122_s25 + $0x8c] sm:$0xf] %v2779_v25  ;;  %v2457_v15 = vmul.f32 %v2448_v5, %v2213_v0  ;;  %v2458_v16 = vmul.f32 %v2448_v5, %v2244_v12  ;;  %v2459_v6 = vmul.f32 %v2448_v5, %v2275_v45  ;;  %p2904_p3 = pnand %p2903_p13, %p3062_p0  ;;  %p2910_p8 = scmp.lt.s32.totalorder %s2908_s3, %s2902_s24 }
 0x3c4   : > { %2531 = vst [vmem:[%s3122_s25 + $0x94] sm:$0xf] %v2780_v26  ;;  %2532 = vst [vmem:[%s3122_s25 + $0x9c] sm:$0xf] %v2781_v27  ;;  %v2460_v7 = vmul.f32 %v2448_v5, %v2306_v2  ;;  %v2461_v42 = vmul.f32 %v2448_v5, %v2336_v39  ;;  %v2462_v40 = vmul.f32 %v2448_v5, %v2367_v30 }
 0x3c5   : > { %v2419_v32 = vld [vmem:[#allocation71 + $0x6] sm:$0x3]  ;;  %2533 = vst [vmem:[%s3122_s25 + $0xa4] sm:$0xf] %v2782_v22  ;;  %2534 = vst [vmem:[%s3122_s25 + $0xac] sm:$0xf] %v2783_v63  ;;  %v2463_v19 = vmul.f32 %v2448_v5, %v2398_v28  ;;  %v2786_v57 = vpack.c.bf16 %v2457_v15, %v2457_v15  ;;  %v2787_v58 = vpack.c.bf16 %v2458_v16, %v2458_v16  ;;  %p2905_p5 = pneg %p2904_p3  ;;  %p2911_p10 = por %p2910_p8, %p2909_p6 }
 0x3c6   : > { %v2420_v31 = vunpack.c.0.f8e4m3b11 %v2419_v32  ;;  %2535 = vst [vmem:[%s3122_s25 + $0xb4] sm:$0xf] %v2784_v35  ;;  %2536 = vst [vmem:[%s3122_s25 + $0xbc] sm:$0xf] %v2785_v44  ;;  %v2788_v59 = vpack.c.bf16 %v2459_v6, %v2459_v6  ;;  %v2789_v36 = vpack.c.bf16 %v2460_v7, %v2460_v7  ;;  %v2790_v37 = vpack.c.bf16 %v2461_v42, %v2461_v42 }
 0x3c7   : > { %v2791_v0 = vpack.c.bf16 %v2462_v40, %v2462_v40  ;;  %v2792_v56 = vpack.c.bf16 %v2463_v19, %v2463_v19  ;;  %2537 = vst [vmem:[%s3122_s25 + $0xc4] sm:$0xf] %v2786_v57  ;;  %2538 = vst [vmem:[%s3122_s25 + $0xcc] sm:$0xf] %v2787_v58  ;;  %p2912_p11 = pnand %p2911_p10, %p2905_p5 }
 0x3c8   : > { %v2424_v50 = vand.u32 2147483647, %v2420_v31  ;;  %vm2426_vm1 = vcmp.ne.f32.partialorder %v2420_v31, %v2420_v31  ;;  %v2427_v29 = vmul.f32 16.0, %v2420_v31  ;;  %2539 = vst [vmem:[%s3122_s25 + $0xd4] sm:$0xf] %v2788_v59 }
 0x3c9   : > { %2540 = vst [vmem:[%s3122_s25 + $0xdc] sm:$0xf] %v2789_v36  ;;  %2541 = vst [vmem:[%s3122_s25 + $0xe4] sm:$0xf] %v2790_v37 }
 0x3ca   : > { %vm3967_vm9 = vcmp.gt.f32.partialorder %v2424_v50, 29.0  ;;  %v2428_v18 = vsel %vm2426_vm1, -0.0, %v2427_v29  ;;  %2542 = vst [vmem:[%s3122_s25 + $0xec] sm:$0xf] %v2791_v0  ;;  %2543 = vst [vmem:[%s3122_s25 + $0xf4] sm:$0xf] %v2792_v56 }
 0x3cb   : > { %v2429_v4 = vsel %vm3967_vm9, nan, %v2428_v18 }
 0x3cc   : > { %v2464_v20 = vmul.f32 %v2448_v5, %v2429_v4 }
 0x3ce   : > { %v2793_v9 = vpack.c.bf16 %v2464_v20, %v2464_v20 }
 0x3d0   : > { %2544 = vst [vmem:[%s3122_s25 + $0xfc] sm:$0xf] %v2793_v9 }
 0x3d1   : > { %2915 = shalt.err (!%p2912_p11)
}
 0x3d2   : > { %s2916_s4 = scalar_lea.hbm %s4035_s20, 4096  ;;  %s2920_s6 = scalar_lea.hbm %s4095_s2, 8192 }
 0x3d3   : > { %p2917_p12 = scmp.ne.s32.totalorder %s4035_s20, %s2916_s4  ;;  %p2921_p4 = scmp.lt.s32.totalorder %s4035_s20, %s4095_s2 }
 0x3d4   : > { %p2922_p7 = scmp.lt.s32.totalorder %s2920_s6, %s2916_s4 }
 0x3d5   : > { %p2918_p1 = pnand %p2917_p12, %p3062_p0 }
 0x3d6   : > { %p2923_p13 = por %p2922_p7, %p2921_p4 }
 0x3d7   : > { %p2919_p9 = pneg %p2918_p1 }
 0x3d9   : > { %p2924_p3 = pnand %p2923_p13, %p2919_p9 }
 0x3db   : > { %2927 = shalt.err (!%p2924_p3)
}
 0x3dc   : > { %s2991_s9 = smov 128   ;;  %s2992_s10 = smov 8  }
 0x3dd   : > { %2797 = dma.vmem_to_hbm [thread:$0]  (%p3062_p0), %s4037_s13, 4096, %s4035_s20, %s2546_s22, %s2991_s9, %s2991_s9, %s2992_s10  }
 0x3de PF: > { %s2577_s11 = sand.u32 1, %s2964_s14   ;;  %p4235_p5 = scmp.ge.s32.totalorder %s2984_s18, 2 }
 0x3df   : > { %s2578_s12 = scalar_lea.sflag [#allocation6], %s2577_s11 }
 0x3e0   : > { %p2804_p6 = pnand %p4235_p5, %p3069_p2 }
 0x3e2   : > { %p2805_p8 = pneg %p2804_p6 }
 0x3e4   : > { %2959 = dma.done.wait (%p2805_p8), %s2578_s12, 4096  }
 0x3e5   : > { %2961 = vsyncadd (%p2805_p8), %s2578_s12, 4294963200  ;;  %s24_s18 = sadd.s32 1, %s2984_s18   ;;  %s4236_s14 = smov %s2968_s0 }
 0x3e6   : > { %p21_p10 = scmp.ge.s32.totalorder %s24_s18, 4   ;;  %s4237_s0 = smov %s2972_s15 }
 0x3e7   : > { %s4238_s15 = smov %s3067_s27  ;;  %s4239_s16 = smov %s2980_s17 }
 0x3e8   : > { %s4240_s17 = smov %s4242_s21  ;;  %23 = sbr.rel (!%p21_p10) target bundleno = 21 (0x15), region = 181 }
 0x3ed   :  { %2583 = vsyncpa [#allocation5], 1 }
 0x3ee   :  { %2585 = vsyncpa [#allocation5 + $0x1], 1 }
 0x3ef   :  { %2586 = vsyncpa [#allocation6], 1 }
 0x3f0   :  { %2588 = vsyncpa [#allocation6 + $0x1], 1 }

</bundles_post_ra>
